<compile_context>
chip_gen: v6e
topology: v6e:2x2x1
jax: 0.10.0
libtpu: 0.0.40
codegen_flags: <defaults>
</compile_context>

<pallas_src>
import functools

import jax
import jax.numpy as jnp
from jax import lax
from jax.experimental import pallas as pl
from jax.experimental.pallas import tpu as pltpu


def _round_up(x, m):
    return ((x + m - 1) // m) * m


# --------------------------------------------------------------------------------------
# Kernel A: fused (patches @ W) * bn_scale + bn_bias [+ ReLU]
# --------------------------------------------------------------------------------------
def _matmul_bn_act_kernel(x_ref, w_ref, s_ref, b_ref, o_ref, *, relu):
    acc = jnp.dot(x_ref[...], w_ref[...], preferred_element_type=jnp.float32)
    acc = acc * s_ref[...] + b_ref[...]
    if relu:
        acc = jnp.maximum(acc, 0.0)
    o_ref[...] = acc.astype(o_ref.dtype)


def _matmul_bn_act(x2d, w, scale, bias, *, relu):
    """y = act((x2d @ w) * scale + bias).  x2d: (M, K), w: (K, N), scale/bias: (N,)."""
    M, K = x2d.shape
    _, N = w.shape

    tm = 512
    Mp = _round_up(max(M, 8), 8)
    if Mp > tm:
        Mp = _round_up(M, tm)
    else:
        tm = Mp
    if Mp != M:
        x2d = jnp.pad(x2d, ((0, Mp - M), (0, 0)))

    out = pl.pallas_call(
        functools.partial(_matmul_bn_act_kernel, relu=relu),
        out_shape=jax.ShapeDtypeStruct((Mp, N), jnp.float32),
        grid_spec=pltpu.PrefetchScalarGridSpec(
            num_scalar_prefetch=0,
            grid=(Mp // tm,),
            in_specs=[
                pl.BlockSpec((tm, K), lambda i: (i, 0)),
                pl.BlockSpec((K, N), lambda i: (0, 0)),
                pl.BlockSpec((1, N), lambda i: (0, 0)),
                pl.BlockSpec((1, N), lambda i: (0, 0)),
            ],
            out_specs=pl.BlockSpec((tm, N), lambda i: (i, 0)),
        ),
        compiler_params=pltpu.CompilerParams(dimension_semantics=("parallel",)),
    )(x2d.astype(jnp.float32), w.astype(jnp.float32),
      scale.reshape(1, N).astype(jnp.float32), bias.reshape(1, N).astype(jnp.float32))
    return out[:M]


# --------------------------------------------------------------------------------------
# Kernel B: fused SE (global mean -> FC -> ReLU -> FC -> sigmoid -> scale) + residual + ReLU
# --------------------------------------------------------------------------------------
def _se_res_act_kernel(x_ref, id_ref, w1_ref, b1_ref, w2_ref, b2_ref, o_ref, *, use_se):
    x = x_ref[0]                                                    # (M, C) f32
    if use_se:
        pooled = jnp.mean(x, axis=0, keepdims=True)                 # (1, C)
        h = jnp.dot(pooled, w1_ref[...], preferred_element_type=jnp.float32) + b1_ref[...]
        h = jnp.maximum(h, 0.0)
        g = jnp.dot(h, w2_ref[...], preferred_element_type=jnp.float32) + b2_ref[...]
        g = jax.nn.sigmoid(g)                                       # (1, C) channel gate
        x = x * g
    o_ref[0] = jnp.maximum(x + id_ref[0], 0.0).astype(o_ref.dtype)


def _se_res_act(x, ident, w1, b1, w2, b2, *, use_se):
    """x, ident: (B, D, H, W, C) channels-last.  Returns relu(se(x) + ident)."""
    B, D, H, W, C = x.shape
    M = D * H * W
    Cr = w1.shape[-1]
    x3 = x.reshape(B, M, C).astype(jnp.float32)
    id3 = ident.reshape(B, M, C).astype(jnp.float32)

    out = pl.pallas_call(
        functools.partial(_se_res_act_kernel, use_se=use_se),
        out_shape=jax.ShapeDtypeStruct((B, M, C), jnp.float32),
        grid_spec=pltpu.PrefetchScalarGridSpec(
            num_scalar_prefetch=0,
            grid=(B,),
            in_specs=[
                pl.BlockSpec((1, M, C), lambda b: (b, 0, 0)),
                pl.BlockSpec((1, M, C), lambda b: (b, 0, 0)),
                pl.BlockSpec((C, Cr), lambda b: (0, 0)),
                pl.BlockSpec((1, Cr), lambda b: (0, 0)),
                pl.BlockSpec((Cr, C), lambda b: (0, 0)),
                pl.BlockSpec((1, C), lambda b: (0, 0)),
            ],
            out_specs=pl.BlockSpec((1, M, C), lambda b: (b, 0, 0)),
        ),
        compiler_params=pltpu.CompilerParams(dimension_semantics=("parallel",)),
    )(x3, id3, w1.astype(jnp.float32), b1.reshape(1, Cr).astype(jnp.float32),
      w2.astype(jnp.float32), b2.reshape(1, C).astype(jnp.float32))
    return out.reshape(B, D, H, W, C)


# --------------------------------------------------------------------------------------
# Conv / pooling glue (layout + patch extraction only; all heavy math is in the kernels)
# --------------------------------------------------------------------------------------
def _im2col_3d(x, stride):
    """x: (B, D, H, W, C) -> (patches (B, Do, Ho, Wo, 27*C), (Do, Ho, Wo)) for 3x3x3, pad=1."""
    B, D, H, W, C = x.shape
    s = stride
    Do = (D + 2 - 3) // s + 1
    Ho = (H + 2 - 3) // s + 1
    Wo = (W + 2 - 3) // s + 1
    xp = jnp.pad(x, ((0, 0), (1, 1), (1, 1), (1, 1), (0, 0)))
    cols = []
    for kd in range(3):
        for kh in range(3):
            for kw in range(3):
                cols.append(xp[:, kd:kd + s * (Do - 1) + 1:s,
                               kh:kh + s * (Ho - 1) + 1:s,
                               kw:kw + s * (Wo - 1) + 1:s, :])
    return jnp.concatenate(cols, axis=-1), (Do, Ho, Wo)


def _conv3x3_bn_act(x, w, scale, bias, *, stride, relu):
    """x: (B, D, H, W, Cin), w: (3,3,3,Cin,Cout) -> (B, Do, Ho, Wo, Cout)."""
    B = x.shape[0]
    Cin = x.shape[-1]
    Cout = w.shape[-1]
    patches, (Do, Ho, Wo) = _im2col_3d(x, stride)
    y = _matmul_bn_act(patches.reshape(B * Do * Ho * Wo, 27 * Cin),
                       w.reshape(27 * Cin, Cout), scale, bias, relu=relu)
    return y.reshape(B, Do, Ho, Wo, Cout)


def _conv1x1_bn(x, w, scale, bias):
    B, D, H, W, Cin = x.shape
    Cout = w.shape[-1]
    y = _matmul_bn_act(x.reshape(B * D * H * W, Cin), w, scale, bias, relu=False)
    return y.reshape(B, D, H, W, Cout)


def _avgpool2(x):
    """AvgPool3d(kernel_size=2, stride=2), channels-last."""
    B, D, H, W, C = x.shape
    return x.reshape(B, D // 2, 2, H // 2, 2, W // 2, 2, C).mean(axis=(2, 4, 6))


# --------------------------------------------------------------------------------------
# BasicBlockNew forward
# --------------------------------------------------------------------------------------
def basic_block_forward(x_ncdhw, params, *, stride=1, se=True):
    """Equivalent of BasicBlockNew.forward.  x: (B, Cin, D, H, W) -> (B, Cout, Do, Ho, Wo)."""
    x = jnp.transpose(x_ncdhw, (0, 2, 3, 4, 1)).astype(jnp.float32)   # channels-last
    in_ch = x.shape[-1]
    out_ch = params["conv1_w"].shape[-1]

    # residual path
    if in_ch == out_ch and stride == 1:
        ident = x
    elif in_ch != out_ch and stride == 1:
        ident = _conv1x1_bn(x, params["res_w"], params["res_scale"], params["res_bias"])
    else:  # in_ch != out_ch and stride > 1   (AvgPool3d(2,2) -> 1x1 conv -> BN)
        ident = _conv1x1_bn(_avgpool2(x), params["res_w"],
                            params["res_scale"], params["res_bias"])

    # main path
    h = _conv3x3_bn_act(x, params["conv1_w"], params["bn1_scale"], params["bn1_bias"],
                        stride=stride, relu=True)
    h = _conv3x3_bn_act(h, params["conv2_w"], params["bn2_scale"], params["bn2_bias"],
                        stride=1, relu=False)

    # SE + residual add + final ReLU (single fused kernel)
    out = _se_res_act(h, ident, params["se_w1"], params["se_b1"],
                      params["se_w2"], params["se_b2"], use_se=se)
    return jnp.transpose(out, (0, 4, 1, 2, 3))


# --------------------------------------------------------------------------------------
# Parameters (inference-mode BN folded into scale/bias) and pure-JAX reference
# --------------------------------------------------------------------------------------
def _fold_bn(gamma, beta, mean, var, eps=1e-5):
    scale = gamma / jnp.sqrt(var + eps)
    return scale, beta - mean * scale


def init_params(key, in_ch, out_ch, *, stride, se_reduction=4):
    ks = iter(jax.random.split(key, 24))

    def bn(c):
        gamma = 1.0 + 0.1 * jax.random.normal(next(ks), (c,), jnp.float32)
        beta = 0.1 * jax.random.normal(next(ks), (c,), jnp.float32)
        mean = 0.1 * jax.random.normal(next(ks), (c,), jnp.float32)
        var = jnp.abs(1.0 + 0.1 * jax.random.normal(next(ks), (c,), jnp.float32))
        return _fold_bn(gamma, beta, mean, var)

    p = {}
    p["conv1_w"] = 0.1 * jax.random.normal(next(ks), (3, 3, 3, in_ch, out_ch), jnp.float32)
    p["bn1_scale"], p["bn1_bias"] = bn(out_ch)
    p["conv2_w"] = 0.1 * jax.random.normal(next(ks), (3, 3, 3, out_ch, out_ch), jnp.float32)
    p["bn2_scale"], p["bn2_bias"] = bn(out_ch)
    if not (in_ch == out_ch and stride == 1):
        p["res_w"] = 0.1 * jax.random.normal(next(ks), (in_ch, out_ch), jnp.float32)
        p["res_scale"], p["res_bias"] = bn(out_ch)
    cr = max(out_ch // se_reduction, 1)
    p["se_w1"] = 0.1 * jax.random.normal(next(ks), (out_ch, cr), jnp.float32)
    p["se_b1"] = 0.1 * jax.random.normal(next(ks), (cr,), jnp.float32)
    p["se_w2"] = 0.1 * jax.random.normal(next(ks), (cr, out_ch), jnp.float32)
    p["se_b2"] = 0.1 * jax.random.normal(next(ks), (out_ch,), jnp.float32)
    return p


def reference_forward(x_ncdhw, params, *, stride, se):
    """Pure-JAX reference (lax.conv) for the self-check."""
    x = jnp.transpose(x_ncdhw, (0, 2, 3, 4, 1)).astype(jnp.float32)

    def conv3(h, w, scale, bias, s, relu):
        y = lax.conv_general_dilated(h, w, (s, s, s), [(1, 1)] * 3,
                                     dimension_numbers=("NDHWC", "DHWIO", "NDHWC"))
        y = y * scale + bias
        return jnp.maximum(y, 0.0) if relu else y

    in_ch = x.shape[-1]
    out_ch = params["conv1_w"].shape[-1]
    if in_ch == out_ch and stride == 1:
        ident = x
    else:
        xi = x
        if stride > 1:
            B, D, H, W, C = x.shape
            xi = x.reshape(B, D // 2, 2, H // 2, 2, W // 2, 2, C).mean(axis=(2, 4, 6))
        ident = (jnp.einsum("bdhwc,co->bdhwo", xi, params["res_w"])
                 * params["res_scale"] + params["res_bias"])

    h = conv3(x, params["conv1_w"], params["bn1_scale"], params["bn1_bias"], stride, True)
    h = conv3(h, params["conv2_w"], params["bn2_scale"], params["bn2_bias"], 1, False)
    if se:
        pooled = h.mean(axis=(1, 2, 3))
        g = jnp.maximum(pooled @ params["se_w1"] + params["se_b1"], 0.0)
        g = jax.nn.sigmoid(g @ params["se_w2"] + params["se_b2"])
        h = h * g[:, None, None, None, :]
    out = jnp.maximum(h + ident, 0.0)
    return jnp.transpose(out, (0, 4, 1, 2, 3))


if __name__ == "__main__":
    key = jax.random.PRNGKey(0)
    kx, kp = jax.random.split(key)

    B, Cin, Cout, D, H, W = 2, 4, 8, 8, 8, 8
    stride = 2                                   # exercises the AvgPool3d + 1x1-conv residual
    x = jax.random.normal(kx, (B, Cin, D, H, W), jnp.float32)
    params = init_params(kp, Cin, Cout, stride=stride)

    fwd = jax.jit(functools.partial(basic_block_forward, stride=stride, se=True))
    out = jax.block_until_ready(fwd(x, params))
    assert out.shape == (B, Cout, D // stride, H // stride, W // stride)
    assert out.dtype == jnp.float32

    ref = reference_forward(x, params, stride=stride, se=True)
    assert jnp.allclose(out, ref, atol=1e-3, rtol=1e-3), float(jnp.max(jnp.abs(out - ref)))

    print("KERNEL_OK")
</pallas_src>

<mosaic_0001>
module attributes {stable_mosaic.version = 11 : i64} {
  func.func @_matmul_bn_act_kernel(%arg0: i32, %arg1: memref<128x4xf32, #tpu.memory_space<vmem>>, %arg2: memref<4x8xf32, #tpu.memory_space<vmem>>, %arg3: memref<1x8xf32, #tpu.memory_space<vmem>>, %arg4: memref<1x8xf32, #tpu.memory_space<vmem>>, %arg5: memref<128x8xf32, #tpu.memory_space<vmem>>) attributes {dimension_semantics = [#tpu.dimension_semantics<parallel>], iteration_bounds = array<i64: 1>, scalar_prefetch = 0 : i64, scratch_operands = 0 : i64, tpu.core_type = #tpu.core_type<tc>, window_params = [{transform_indices = @transform_0, window_bounds = array<i64: 128, 4>}, {pipeline_mode = #tpu.pipeline_mode<synchronous>, transform_indices = @transform_1, window_bounds = array<i64: 4, 8>}, {pipeline_mode = #tpu.pipeline_mode<synchronous>, transform_indices = @transform_2, window_bounds = array<i64: 1, 8>}, {pipeline_mode = #tpu.pipeline_mode<synchronous>, transform_indices = @transform_3, window_bounds = array<i64: 1, 8>}, {transform_indices = @transform_4, window_bounds = array<i64: 128, 8>}]} {
    %c0 = arith.constant 0 : index
    %c0_0 = arith.constant 0 : index
    %0 = vector.load %arg1[%c0, %c0_0] : memref<128x4xf32, #tpu.memory_space<vmem>>, vector<128x4xf32>
    %c0_1 = arith.constant 0 : index
    %c0_2 = arith.constant 0 : index
    %1 = vector.load %arg2[%c0_1, %c0_2] : memref<4x8xf32, #tpu.memory_space<vmem>>, vector<4x8xf32>
    %cst = arith.constant dense<0.000000e+00> : vector<128x8xf32>
    %2 = tpu.matmul %0, %1, %cst {dimension_numbers = #tpu.dot_dimension_numbers<[1], [0], [0], [1], [0, 0, 1, 1], [], []>} : vector<128x4xf32>, vector<4x8xf32>, vector<128x8xf32> -> vector<128x8xf32>
    %c0_3 = arith.constant 0 : index
    %c0_4 = arith.constant 0 : index
    %3 = vector.load %arg3[%c0_3, %c0_4] : memref<1x8xf32, #tpu.memory_space<vmem>>, vector<1x8xf32>
    %4 = vector.broadcast %3 : vector<1x8xf32> to vector<128x8xf32>
    %5 = arith.mulf %2, %4 : vector<128x8xf32>
    %c0_5 = arith.constant 0 : index
    %c0_6 = arith.constant 0 : index
    %6 = vector.load %arg4[%c0_5, %c0_6] : memref<1x8xf32, #tpu.memory_space<vmem>>, vector<1x8xf32>
    %7 = vector.broadcast %6 : vector<1x8xf32> to vector<128x8xf32>
    %8 = arith.addf %5, %7 : vector<128x8xf32>
    %c0_7 = arith.constant 0 : index
    %c0_8 = arith.constant 0 : index
    %9 = vector.load %arg5[%c0_7, %c0_8] : memref<128x8xf32, #tpu.memory_space<vmem>>, vector<128x8xf32>
    tpu.vector_store %arg5[%c0_7, %c0_8], %8 {strides = array<i32>} : memref<128x8xf32, #tpu.memory_space<vmem>>, vector<128x8xf32>,
    return
  }
  func.func @transform_0(%arg0: i32) -> (i32, i32) {
    %c0_i32 = arith.constant 0 : i32
    %c0_i32_0 = arith.constant 0 : i32
    return %arg0, %c0_i32 : i32, i32
  }
  func.func @transform_1(%arg0: i32) -> (i32, i32) {
    %c0_i32 = arith.constant 0 : i32
    %c0_i32_0 = arith.constant 0 : i32
    %c0_i32_1 = arith.constant 0 : i32
    return %c0_i32, %c0_i32_0 : i32, i32
  }
  func.func @transform_2(%arg0: i32) -> (i32, i32) {
    %c0_i32 = arith.constant 0 : i32
    %c0_i32_0 = arith.constant 0 : i32
    %c0_i32_1 = arith.constant 0 : i32
    return %c0_i32, %c0_i32_0 : i32, i32
  }
  func.func @transform_3(%arg0: i32) -> (i32, i32) {
    %c0_i32 = arith.constant 0 : i32
    %c0_i32_0 = arith.constant 0 : i32
    %c0_i32_1 = arith.constant 0 : i32
    return %c0_i32, %c0_i32_0 : i32, i32
  }
  func.func @transform_4(%arg0: i32) -> (i32, i32) {
    %c0_i32 = arith.constant 0 : i32
    %c0_i32_0 = arith.constant 0 : i32
    return %arg0, %c0_i32 : i32, i32
  }
}

module attributes {stable_mosaic.version = 11 : i64} {
  func.func @_matmul_bn_act_kernel(%arg0: i32, %arg1: memref<128x108xf32, #tpu.memory_space<vmem>>, %arg2: memref<108x8xf32, #tpu.memory_space<vmem>>, %arg3: memref<1x8xf32, #tpu.memory_space<vmem>>, %arg4: memref<1x8xf32, #tpu.memory_space<vmem>>, %arg5: memref<128x8xf32, #tpu.memory_space<vmem>>) attributes {dimension_semantics = [#tpu.dimension_semantics<parallel>], iteration_bounds = array<i64: 1>, scalar_prefetch = 0 : i64, scratch_operands = 0 : i64, tpu.core_type = #tpu.core_type<tc>, window_params = [{transform_indices = @transform_0, window_bounds = array<i64: 128, 108>}, {pipeline_mode = #tpu.pipeline_mode<synchronous>, transform_indices = @transform_1, window_bounds = array<i64: 108, 8>}, {pipeline_mode = #tpu.pipeline_mode<synchronous>, transform_indices = @transform_2, window_bounds = array<i64: 1, 8>}, {pipeline_mode = #tpu.pipeline_mode<synchronous>, transform_indices = @transform_3, window_bounds = array<i64: 1, 8>}, {transform_indices = @transform_4, window_bounds = array<i64: 128, 8>}]} {
    %c0 = arith.constant 0 : index
    %c0_0 = arith.constant 0 : index
    %0 = vector.load %arg1[%c0, %c0_0] : memref<128x108xf32, #tpu.memory_space<vmem>>, vector<128x108xf32>
    %c0_1 = arith.constant 0 : index
    %c0_2 = arith.constant 0 : index
    %1 = vector.load %arg2[%c0_1, %c0_2] : memref<108x8xf32, #tpu.memory_space<vmem>>, vector<108x8xf32>
    %cst = arith.constant dense<0.000000e+00> : vector<128x8xf32>
    %2 = tpu.matmul %0, %1, %cst {dimension_numbers = #tpu.dot_dimension_numbers<[1], [0], [0], [1], [0, 0, 1, 1], [], []>} : vector<128x108xf32>, vector<108x8xf32>, vector<128x8xf32> -> vector<128x8xf32>
    %c0_3 = arith.constant 0 : index
    %c0_4 = arith.constant 0 : index
    %3 = vector.load %arg3[%c0_3, %c0_4] : memref<1x8xf32, #tpu.memory_space<vmem>>, vector<1x8xf32>
    %4 = vector.broadcast %3 : vector<1x8xf32> to vector<128x8xf32>
    %5 = arith.mulf %2, %4 : vector<128x8xf32>
    %c0_5 = arith.constant 0 : index
    %c0_6 = arith.constant 0 : index
    %6 = vector.load %arg4[%c0_5, %c0_6] : memref<1x8xf32, #tpu.memory_space<vmem>>, vector<1x8xf32>
    %7 = vector.broadcast %6 : vector<1x8xf32> to vector<128x8xf32>
    %8 = arith.addf %5, %7 : vector<128x8xf32>
    %cst_7 = arith.constant 0.000000e+00 : f32
    %9 = vector.broadcast %cst_7 : f32 to vector<128x8xf32>
    %10 = arith.maximumf %8, %9 : vector<128x8xf32>
    %c0_8 = arith.constant 0 : index
    %c0_9 = arith.constant 0 : index
    %11 = vector.load %arg5[%c0_8, %c0_9] : memref<128x8xf32, #tpu.memory_space<vmem>>, vector<128x8xf32>
    tpu.vector_store %arg5[%c0_8, %c0_9], %10 {strides = array<i32>} : memref<128x8xf32, #tpu.memory_space<vmem>>, vector<128x8xf32>,
    return
  }
  func.func @transform_0(%arg0: i32) -> (i32, i32) {
    %c0_i32 = arith.constant 0 : i32
    %c0_i32_0 = arith.constant 0 : i32
    return %arg0, %c0_i32 : i32, i32
  }
  func.func @transform_1(%arg0: i32) -> (i32, i32) {
    %c0_i32 = arith.constant 0 : i32
    %c0_i32_0 = arith.constant 0 : i32
    %c0_i32_1 = arith.constant 0 : i32
    return %c0_i32, %c0_i32_0 : i32, i32
  }
  func.func @transform_2(%arg0: i32) -> (i32, i32) {
    %c0_i32 = arith.constant 0 : i32
    %c0_i32_0 = arith.constant 0 : i32
    %c0_i32_1 = arith.constant 0 : i32
    return %c0_i32, %c0_i32_0 : i32, i32
  }
  func.func @transform_3(%arg0: i32) -> (i32, i32) {
    %c0_i32 = arith.constant 0 : i32
    %c0_i32_0 = arith.constant 0 : i32
    %c0_i32_1 = arith.constant 0 : i32
    return %c0_i32, %c0_i32_0 : i32, i32
  }
  func.func @transform_4(%arg0: i32) -> (i32, i32) {
    %c0_i32 = arith.constant 0 : i32
    %c0_i32_0 = arith.constant 0 : i32
    return %arg0, %c0_i32 : i32, i32
  }
}

module attributes {stable_mosaic.version = 11 : i64} {
  func.func @_matmul_bn_act_kernel(%arg0: i32, %arg1: memref<128x216xf32, #tpu.memory_space<vmem>>, %arg2: memref<216x8xf32, #tpu.memory_space<vmem>>, %arg3: memref<1x8xf32, #tpu.memory_space<vmem>>, %arg4: memref<1x8xf32, #tpu.memory_space<vmem>>, %arg5: memref<128x8xf32, #tpu.memory_space<vmem>>) attributes {dimension_semantics = [#tpu.dimension_semantics<parallel>], iteration_bounds = array<i64: 1>, scalar_prefetch = 0 : i64, scratch_operands = 0 : i64, tpu.core_type = #tpu.core_type<tc>, window_params = [{transform_indices = @transform_0, window_bounds = array<i64: 128, 216>}, {pipeline_mode = #tpu.pipeline_mode<synchronous>, transform_indices = @transform_1, window_bounds = array<i64: 216, 8>}, {pipeline_mode = #tpu.pipeline_mode<synchronous>, transform_indices = @transform_2, window_bounds = array<i64: 1, 8>}, {pipeline_mode = #tpu.pipeline_mode<synchronous>, transform_indices = @transform_3, window_bounds = array<i64: 1, 8>}, {transform_indices = @transform_4, window_bounds = array<i64: 128, 8>}]} {
    %c0 = arith.constant 0 : index
    %c0_0 = arith.constant 0 : index
    %0 = vector.load %arg1[%c0, %c0_0] : memref<128x216xf32, #tpu.memory_space<vmem>>, vector<128x216xf32>
    %c0_1 = arith.constant 0 : index
    %c0_2 = arith.constant 0 : index
    %1 = vector.load %arg2[%c0_1, %c0_2] : memref<216x8xf32, #tpu.memory_space<vmem>>, vector<216x8xf32>
    %cst = arith.constant dense<0.000000e+00> : vector<128x8xf32>
    %2 = tpu.matmul %0, %1, %cst {dimension_numbers = #tpu.dot_dimension_numbers<[1], [0], [0], [1], [0, 0, 1, 1], [], []>} : vector<128x216xf32>, vector<216x8xf32>, vector<128x8xf32> -> vector<128x8xf32>
    %c0_3 = arith.constant 0 : index
    %c0_4 = arith.constant 0 : index
    %3 = vector.load %arg3[%c0_3, %c0_4] : memref<1x8xf32, #tpu.memory_space<vmem>>, vector<1x8xf32>
    %4 = vector.broadcast %3 : vector<1x8xf32> to vector<128x8xf32>
    %5 = arith.mulf %2, %4 : vector<128x8xf32>
    %c0_5 = arith.constant 0 : index
    %c0_6 = arith.constant 0 : index
    %6 = vector.load %arg4[%c0_5, %c0_6] : memref<1x8xf32, #tpu.memory_space<vmem>>, vector<1x8xf32>
    %7 = vector.broadcast %6 : vector<1x8xf32> to vector<128x8xf32>
    %8 = arith.addf %5, %7 : vector<128x8xf32>
    %c0_7 = arith.constant 0 : index
    %c0_8 = arith.constant 0 : index
    %9 = vector.load %arg5[%c0_7, %c0_8] : memref<128x8xf32, #tpu.memory_space<vmem>>, vector<128x8xf32>
    tpu.vector_store %arg5[%c0_7, %c0_8], %8 {strides = array<i32>} : memref<128x8xf32, #tpu.memory_space<vmem>>, vector<128x8xf32>,
    return
  }
  func.func @transform_0(%arg0: i32) -> (i32, i32) {
    %c0_i32 = arith.constant 0 : i32
    %c0_i32_0 = arith.constant 0 : i32
    return %arg0, %c0_i32 : i32, i32
  }
  func.func @transform_1(%arg0: i32) -> (i32, i32) {
    %c0_i32 = arith.constant 0 : i32
    %c0_i32_0 = arith.constant 0 : i32
    %c0_i32_1 = arith.constant 0 : i32
    return %c0_i32, %c0_i32_0 : i32, i32
  }
  func.func @transform_2(%arg0: i32) -> (i32, i32) {
    %c0_i32 = arith.constant 0 : i32
    %c0_i32_0 = arith.constant 0 : i32
    %c0_i32_1 = arith.constant 0 : i32
    return %c0_i32, %c0_i32_0 : i32, i32
  }
  func.func @transform_3(%arg0: i32) -> (i32, i32) {
    %c0_i32 = arith.constant 0 : i32
    %c0_i32_0 = arith.constant 0 : i32
    %c0_i32_1 = arith.constant 0 : i32
    return %c0_i32, %c0_i32_0 : i32, i32
  }
  func.func @transform_4(%arg0: i32) -> (i32, i32) {
    %c0_i32 = arith.constant 0 : i32
    %c0_i32_0 = arith.constant 0 : i32
    return %arg0, %c0_i32 : i32, i32
  }
}

module attributes {stable_mosaic.version = 11 : i64} {
  func.func @_se_res_act_kernel(%arg0: i32, %arg1: memref<1x64x8xf32, #tpu.memory_space<vmem>>, %arg2: memref<1x64x8xf32, #tpu.memory_space<vmem>>, %arg3: memref<8x2xf32, #tpu.memory_space<vmem>>, %arg4: memref<1x2xf32, #tpu.memory_space<vmem>>, %arg5: memref<2x8xf32, #tpu.memory_space<vmem>>, %arg6: memref<1x8xf32, #tpu.memory_space<vmem>>, %arg7: memref<1x64x8xf32, #tpu.memory_space<vmem>>) attributes {dimension_semantics = [#tpu.dimension_semantics<parallel>], iteration_bounds = array<i64: 2>, scalar_prefetch = 0 : i64, scratch_operands = 0 : i64, tpu.core_type = #tpu.core_type<tc>, window_params = [{transform_indices = @transform_0, window_bounds = array<i64: 1, 64, 8>}, {transform_indices = @transform_1, window_bounds = array<i64: 1, 64, 8>}, {pipeline_mode = #tpu.pipeline_mode<synchronous>, transform_indices = @transform_2, window_bounds = array<i64: 8, 2>}, {pipeline_mode = #tpu.pipeline_mode<synchronous>, transform_indices = @transform_3, window_bounds = array<i64: 1, 2>}, {pipeline_mode = #tpu.pipeline_mode<synchronous>, transform_indices = @transform_4, window_bounds = array<i64: 2, 8>}, {pipeline_mode = #tpu.pipeline_mode<synchronous>, transform_indices = @transform_5, window_bounds = array<i64: 1, 8>}, {transform_indices = @transform_6, window_bounds = array<i64: 1, 64, 8>}]} {
    %c0 = arith.constant 0 : index
    %c0_0 = arith.constant 0 : index
    %c0_1 = arith.constant 0 : index
    %0 = vector.load %arg1[%c0, %c0_0, %c0_1] : memref<1x64x8xf32, #tpu.memory_space<vmem>>, vector<1x64x8xf32>
    %1 = vector.shape_cast %0 : vector<1x64x8xf32> to vector<64x8xf32>
    %cst = arith.constant dense<0.000000e+00> : vector<8xf32>
    %2 = vector.multi_reduction <add>, %1, %cst [0] : vector<64x8xf32> to vector<8xf32>
    %3 = vector.shape_cast %2 : vector<8xf32> to vector<1x8xf32>
    %cst_2 = arith.constant 6.400000e+01 : f32
    %4 = vector.broadcast %cst_2 : f32 to vector<1x8xf32>
    %5 = arith.divf %3, %4 : vector<1x8xf32>
    %c0_3 = arith.constant 0 : index
    %c0_4 = arith.constant 0 : index
    %6 = vector.load %arg3[%c0_3, %c0_4] : memref<8x2xf32, #tpu.memory_space<vmem>>, vector<8x2xf32>
    %cst_5 = arith.constant dense<0.000000e+00> : vector<1x2xf32>
    %7 = tpu.matmul %5, %6, %cst_5 {dimension_numbers = #tpu.dot_dimension_numbers<[1], [0], [0], [1], [0, 0, 1, 1], [], []>} : vector<1x8xf32>, vector<8x2xf32>, vector<1x2xf32> -> vector<1x2xf32>
    %c0_6 = arith.constant 0 : index
    %c0_7 = arith.constant 0 : index
    %8 = vector.load %arg4[%c0_6, %c0_7] : memref<1x2xf32, #tpu.memory_space<vmem>>, vector<1x2xf32>
    %9 = arith.addf %7, %8 : vector<1x2xf32>
    %cst_8 = arith.constant 0.000000e+00 : f32
    %10 = vector.broadcast %cst_8 : f32 to vector<1x2xf32>
    %11 = arith.maximumf %9, %10 : vector<1x2xf32>
    %c0_9 = arith.constant 0 : index
    %c0_10 = arith.constant 0 : index
    %12 = vector.load %arg5[%c0_9, %c0_10] : memref<2x8xf32, #tpu.memory_space<vmem>>, vector<2x8xf32>
    %cst_11 = arith.constant dense<0.000000e+00> : vector<1x8xf32>
    %13 = tpu.matmul %11, %12, %cst_11 {dimension_numbers = #tpu.dot_dimension_numbers<[1], [0], [0], [1], [0, 0, 1, 1], [], []>} : vector<1x2xf32>, vector<2x8xf32>, vector<1x8xf32> -> vector<1x8xf32>
    %c0_12 = arith.constant 0 : index
    %c0_13 = arith.constant 0 : index
    %14 = vector.load %arg6[%c0_12, %c0_13] : memref<1x8xf32, #tpu.memory_space<vmem>>, vector<1x8xf32>
    %15 = arith.addf %13, %14 : vector<1x8xf32>
    %16 = arith.negf %15 : vector<1x8xf32>
    %17 = math.exp %16 : vector<1x8xf32>
    %cst_14 = arith.constant 1.000000e+00 : f32
    %18 = vector.broadcast %cst_14 : f32 to vector<1x8xf32>
    %19 = arith.addf %18, %17 : vector<1x8xf32>
    %20 = arith.divf %18, %19 : vector<1x8xf32>
    %21 = vector.broadcast %20 : vector<1x8xf32> to vector<64x8xf32>
    %22 = arith.mulf %1, %21 : vector<64x8xf32>
    %c0_15 = arith.constant 0 : index
    %c0_16 = arith.constant 0 : index
    %c0_17 = arith.constant 0 : index
    %23 = vector.load %arg2[%c0_15, %c0_16, %c0_17] : memref<1x64x8xf32, #tpu.memory_space<vmem>>, vector<1x64x8xf32>
    %24 = vector.shape_cast %23 : vector<1x64x8xf32> to vector<64x8xf32>
    %25 = arith.addf %22, %24 : vector<64x8xf32>
    %cst_18 = arith.constant 0.000000e+00 : f32
    %26 = vector.broadcast %cst_18 : f32 to vector<64x8xf32>
    %27 = arith.maximumf %25, %26 : vector<64x8xf32>
    %c0_19 = arith.constant 0 : index
    %c0_20 = arith.constant 0 : index
    %c0_21 = arith.constant 0 : index
    %28 = vector.load %arg7[%c0_19, %c0_20, %c0_21] : memref<1x64x8xf32, #tpu.memory_space<vmem>>, vector<1x64x8xf32>
    %29 = vector.shape_cast %28 : vector<1x64x8xf32> to vector<64x8xf32>
    %30 = vector.shape_cast %27 : vector<64x8xf32> to vector<1x64x8xf32>
    tpu.vector_store %arg7[%c0_19, %c0_20, %c0_21], %30 {strides = array<i32>} : memref<1x64x8xf32, #tpu.memory_space<vmem>>, vector<1x64x8xf32>,
    return
  }
  func.func @transform_0(%arg0: i32) -> (i32, i32, i32) {
    %c0_i32 = arith.constant 0 : i32
    %c0_i32_0 = arith.constant 0 : i32
    %c0_i32_1 = arith.constant 0 : i32
    return %arg0, %c0_i32, %c0_i32_0 : i32, i32, i32
  }
  func.func @transform_1(%arg0: i32) -> (i32, i32, i32) {
    %c0_i32 = arith.constant 0 : i32
    %c0_i32_0 = arith.constant 0 : i32
    %c0_i32_1 = arith.constant 0 : i32
    return %arg0, %c0_i32, %c0_i32_0 : i32, i32, i32
  }
  func.func @transform_2(%arg0: i32) -> (i32, i32) {
    %c0_i32 = arith.constant 0 : i32
    %c0_i32_0 = arith.constant 0 : i32
    %c0_i32_1 = arith.constant 0 : i32
    return %c0_i32, %c0_i32_0 : i32, i32
  }
  func.func @transform_3(%arg0: i32) -> (i32, i32) {
    %c0_i32 = arith.constant 0 : i32
    %c0_i32_0 = arith.constant 0 : i32
    %c0_i32_1 = arith.constant 0 : i32
    return %c0_i32, %c0_i32_0 : i32, i32
  }
  func.func @transform_4(%arg0: i32) -> (i32, i32) {
    %c0_i32 = arith.constant 0 : i32
    %c0_i32_0 = arith.constant 0 : i32
    %c0_i32_1 = arith.constant 0 : i32
    return %c0_i32, %c0_i32_0 : i32, i32
  }
  func.func @transform_5(%arg0: i32) -> (i32, i32) {
    %c0_i32 = arith.constant 0 : i32
    %c0_i32_0 = arith.constant 0 : i32
    %c0_i32_1 = arith.constant 0 : i32
    return %c0_i32, %c0_i32_0 : i32, i32
  }
  func.func @transform_6(%arg0: i32) -> (i32, i32, i32) {
    %c0_i32 = arith.constant 0 : i32
    %c0_i32_0 = arith.constant 0 : i32
    %c0_i32_1 = arith.constant 0 : i32
    return %arg0, %c0_i32, %c0_i32_0 : i32, i32, i32
  }
}

</mosaic_0001>

<bundles_post_ra>
// kernel: basic_block_forward.4
= control target key start
LH: loop header
LB: loop body
LE: loop exit
PB: predicated region body
PF: predicated region fallthrough
CT: control target
= control target key end

     0   :  { %vm83_vm0 = vcmask 1043456   ;;  %vm34_vm1 = vcmask 31744   ;;  %vm278_vm2 = vcmask 64512   ;;  %s543_s1 = inlined_call_operand.vmem [shape: f32[4,8], index: 1, kind: input, shape index: {}]   ;;  %s544_s0 = inlined_call_operand.vmem [shape: f32[128,4], index: 0, kind: input, shape index: {}]   ;;  %s545_s2 = inlined_call_operand.vmem [shape: f32[1,8], index: 2, kind: input, shape index: {}]   ;;  %s546_s3 = inlined_call_operand.vmem [shape: f32[1,8], index: 3, kind: input, shape index: {}]   ;;  %s547_s4 = inlined_call_operand.vmem [shape: f32[128,8], index: 4, kind: output, shape index: {}]  }
   0x1   :  { %v33_v0 = vld [vmem:[%s543_s1] sm:$0xf]  ;;  %v18_v3 = vld [vmem:[%s544_s0 + $0x8] sm:$0xff]  ;;  %v19_v5 = vld [vmem:[%s544_s0 + $0x10] sm:$0xff] }
   0x2   :  { %v17_v1 = vld [vmem:[%s544_s0] sm:$0xff]  ;;  %335 = vmatprep.subr.msk.mxu0 %vm83_vm0, %v33_v0  ;;  %361 = vmatprep.subr.msk.mxu1 %vm83_vm0, %v33_v0  ;;  %v26_v4 = vld [vmem:[%s544_s0 + $0x48] sm:$0xff]  ;;  %v27_v6 = vld [vmem:[%s544_s0 + $0x50] sm:$0xff] }
   0x3   :  { %v25_v2 = vld [vmem:[%s544_s0 + $0x40] sm:$0xff]  ;;  %336 = vmatpush3.msk.msra.mxu0 %vm83_vm0, %v33_v0  ;;  %362 = vmatpush3.msk.msra.mxu1 %vm83_vm0, %v33_v0  ;;  %v20_v7 = vld [vmem:[%s544_s0 + $0x18] sm:$0xff]  ;;  %v22_v11 = vld [vmem:[%s544_s0 + $0x28] sm:$0xff] }
   0x4   :  { %337 = vmatprep.mubr.msk.f32.mxu0 %vm34_vm1, %v17_v1  ;;  %349 = vmatprep.mubr.msk.f32.mxu1 %vm34_vm1, %v25_v2  ;;  %v28_v8 = vld [vmem:[%s544_s0 + $0x58] sm:$0xff]  ;;  %v21_v9 = vld [vmem:[%s544_s0 + $0x20] sm:$0xff]  ;;  %v30_v12 = vld [vmem:[%s544_s0 + $0x68] sm:$0xff] }
   0x5   :  { %338 = vmatmul.mubr.msk.f32.vlgmr.msra.gmra.mxu0 %vm34_vm1, %v18_v3  ;;  %350 = vmatmul.mubr.msk.f32.vlgmr.msra.gmra.mxu1 %vm34_vm1, %v26_v4  ;;  %v29_v10 = vld [vmem:[%s544_s0 + $0x60] sm:$0xff]  ;;  %v23_v13 = vld [vmem:[%s544_s0 + $0x30] sm:$0xff]  ;;  %v24_v15 = vld [vmem:[%s544_s0 + $0x38] sm:$0xff] }
   0x6   :  { %340 = vmatprep.mubr.msk.f32.mxu0 %vm34_vm1, %v19_v5  ;;  %352 = vmatprep.mubr.msk.f32.mxu1 %vm34_vm1, %v27_v6  ;;  %v31_v14 = vld [vmem:[%s544_s0 + $0x70] sm:$0xff]  ;;  %v32_v16 = vld [vmem:[%s544_s0 + $0x78] sm:$0xff]  ;;  %v316_v17 = vld [vmem:[%s545_s2] ss:$0 sm:$0xff] }
   0x7   :  { %v461_v19 = vld [vmem:[%s546_s3] ss:$0 sm:$0xff] }
   0x9   :  { %341 = vmatmul.mubr.msk.f32.gmra.mxu0 %vm34_vm1, %v20_v7  ;;  %353 = vmatmul.mubr.msk.f32.gmra.mxu1 %vm34_vm1, %v28_v8 }
   0xa   :  { %343 = vmatprep.mubr.msk.f32.mxu0 %vm34_vm1, %v21_v9  ;;  %355 = vmatprep.mubr.msk.f32.mxu1 %vm34_vm1, %v29_v10 }
   0xd   :  { %344 = vmatmul.mubr.msk.f32.gmra.mxu0 %vm34_vm1, %v22_v11  ;;  %356 = vmatmul.mubr.msk.f32.gmra.mxu1 %vm34_vm1, %v30_v12 }
   0xe   :  { %346 = vmatprep.mubr.msk.f32.mxu0 %vm34_vm1, %v23_v13  ;;  %358 = vmatprep.mubr.msk.f32.mxu1 %vm34_vm1, %v31_v14 }
  0x11   :  { %347 = vmatmul.mubr.msk.f32.gmra.mxu0 %vm34_vm1, %v24_v15  ;;  %359 = vmatmul.mubr.msk.f32.gmra.mxu1 %vm34_vm1, %v32_v16 }
  0xc5   :  { %v339_v18 = vpop.f32.mrf.mxu0  ;;  %v351_v20 = vpop.f32.mrf.mxu1 }
  0xc6   :  { %v240_v21 = vmul.f32 %v339_v18, %v316_v17  ;;  %v248_v22 = vmul.f32 %v351_v20, %v316_v17 }
  0xc7   :  { %v153_v23 = vpop.f32.mrf.mxu0  ;;  %v193_v24 = vpop.f32.mrf.mxu1 }
  0xc8   :  { %v263_v25 = vadd.f32 %v461_v19, %v240_v21  ;;  %v271_v26 = vadd.f32 %v461_v19, %v248_v22  ;;  %v239_v27 = vmul.f32 %v316_v17, %v153_v23  ;;  %v247_v28 = vmul.f32 %v316_v17, %v193_v24 }
  0xc9   :  { %v342_v29 = vpop.f32.mrf.mxu0  ;;  %v354_v30 = vpop.f32.mrf.mxu1 }
  0xca   :  { %280 = vst.msk [vmem:[%s547_s4 + $0x8] sm:$0xff] %vm278_vm2, %v263_v25  ;;  %288 = vst.msk [vmem:[%s547_s4 + $0x48] sm:$0xff] %vm278_vm2, %v271_v26  ;;  %v262_v31 = vadd.f32 %v461_v19, %v239_v27  ;;  %v270_v32 = vadd.f32 %v461_v19, %v247_v28  ;;  %v242_v33 = vmul.f32 %v342_v29, %v316_v17 }
  0xcb   :  { %v250_v34 = vmul.f32 %v354_v30, %v316_v17  ;;  %v163_v35 = vpop.f32.mrf.mxu0  ;;  %v203_v36 = vpop.f32.mrf.mxu1 }
  0xcc   :  { %279 = vst.msk [vmem:[%s547_s4] sm:$0xff] %vm278_vm2, %v262_v31  ;;  %287 = vst.msk [vmem:[%s547_s4 + $0x40] sm:$0xff] %vm278_vm2, %v270_v32  ;;  %v265_v37 = vadd.f32 %v461_v19, %v242_v33  ;;  %v241_v39 = vmul.f32 %v316_v17, %v163_v35  ;;  %v249_v40 = vmul.f32 %v316_v17, %v203_v36 }
  0xcd   :  { %v273_v38 = vadd.f32 %v461_v19, %v250_v34  ;;  %v345_v41 = vpop.f32.mrf.mxu0  ;;  %v357_v42 = vpop.f32.mrf.mxu1 }
  0xce   :  { %282 = vst.msk [vmem:[%s547_s4 + $0x18] sm:$0xff] %vm278_vm2, %v265_v37  ;;  %v264_v43 = vadd.f32 %v461_v19, %v241_v39  ;;  %v272_v44 = vadd.f32 %v461_v19, %v249_v40  ;;  %v244_v45 = vmul.f32 %v345_v41, %v316_v17  ;;  %v252_v46 = vmul.f32 %v357_v42, %v316_v17 }
  0xcf   :  { %290 = vst.msk [vmem:[%s547_s4 + $0x58] sm:$0xff] %vm278_vm2, %v273_v38  ;;  %v173_v47 = vpop.f32.mrf.mxu0  ;;  %v213_v48 = vpop.f32.mrf.mxu1 }
  0xd0   :  { %281 = vst.msk [vmem:[%s547_s4 + $0x10] sm:$0xff] %vm278_vm2, %v264_v43  ;;  %289 = vst.msk [vmem:[%s547_s4 + $0x50] sm:$0xff] %vm278_vm2, %v272_v44  ;;  %v267_v49 = vadd.f32 %v461_v19, %v244_v45  ;;  %v275_v50 = vadd.f32 %v461_v19, %v252_v46  ;;  %v243_v51 = vmul.f32 %v316_v17, %v173_v47 }
  0xd1   :  { %v251_v52 = vmul.f32 %v316_v17, %v213_v48  ;;  %v348_v53 = vpop.f32.mrf.mxu0  ;;  %v360_v54 = vpop.f32.mrf.mxu1 }
  0xd2   :  { %284 = vst.msk [vmem:[%s547_s4 + $0x28] sm:$0xff] %vm278_vm2, %v267_v49  ;;  %292 = vst.msk [vmem:[%s547_s4 + $0x68] sm:$0xff] %vm278_vm2, %v275_v50  ;;  %v266_v55 = vadd.f32 %v461_v19, %v243_v51  ;;  %v246_v57 = vmul.f32 %v348_v53, %v316_v17  ;;  %v254_v58 = vmul.f32 %v360_v54, %v316_v17 }
  0xd3   :  { %v274_v56 = vadd.f32 %v461_v19, %v251_v52  ;;  %v183_v59 = vpop.f32.mrf.mxu0  ;;  %v223_v60 = vpop.f32.mrf.mxu1 }
  0xd4   :  { %283 = vst.msk [vmem:[%s547_s4 + $0x20] sm:$0xff] %vm278_vm2, %v266_v55  ;;  %v269_v61 = vadd.f32 %v461_v19, %v246_v57  ;;  %v277_v62 = vadd.f32 %v461_v19, %v254_v58  ;;  %v245_v63 = vmul.f32 %v316_v17, %v183_v59  ;;  %v253_v0 = vmul.f32 %v316_v17, %v223_v60 }
  0xd5   :  { %291 = vst.msk [vmem:[%s547_s4 + $0x60] sm:$0xff] %vm278_vm2, %v274_v56 }
  0xd6   :  { %286 = vst.msk [vmem:[%s547_s4 + $0x38] sm:$0xff] %vm278_vm2, %v269_v61  ;;  %294 = vst.msk [vmem:[%s547_s4 + $0x78] sm:$0xff] %vm278_vm2, %v277_v62  ;;  %v268_v1 = vadd.f32 %v461_v19, %v245_v63  ;;  %v276_v2 = vadd.f32 %v461_v19, %v253_v0 }
  0xd8   :  { %285 = vst.msk [vmem:[%s547_s4 + $0x30] sm:$0xff] %vm278_vm2, %v268_v1  ;;  %293 = vst.msk [vmem:[%s547_s4 + $0x70] sm:$0xff] %vm278_vm2, %v276_v2 }

// kernel: basic_block_forward.5
= control target key start
LH: loop header
LB: loop body
LE: loop exit
PB: predicated region body
PF: predicated region fallthrough
CT: control target
= control target key end

     0   :  { %vm96_vm0 = vcmask 1043456   ;;  %vm47_vm1 = vcmask 883712   ;;  %vm307_vm2 = vcmask 64512   ;;  %s694_s1 = inlined_call_operand.vmem [shape: f32[108,8], index: 1, kind: input, shape index: {}]   ;;  %s695_s0 = inlined_call_operand.vmem [shape: f32[128,108], index: 0, kind: input, shape index: {}]   ;;  %s696_s2 = inlined_call_operand.vmem [shape: f32[1,8], index: 2, kind: input, shape index: {}]   ;;  %s697_s3 = inlined_call_operand.vmem [shape: f32[1,8], index: 3, kind: input, shape index: {}]   ;;  %s698_s4 = inlined_call_operand.vmem [shape: f32[128,8], index: 4, kind: output, shape index: {}]  }
   0x1   :  { %v46_v0 = vld [vmem:[%s694_s1 + $0x68] sm:$0xf]  ;;  %v45_v1 = vld [vmem:[%s694_s1 + $0x60] sm:$0xff]  ;;  %v44_v2 = vld [vmem:[%s694_s1 + $0x58] sm:$0xff] }
   0x2   :  { %377 = vmatprep.subr.msk.mxu0 %vm96_vm0, %v46_v0  ;;  %429 = vmatprep.subr.msk.mxu1 %vm96_vm0, %v46_v0  ;;  %v43_v3 = vld [vmem:[%s694_s1 + $0x50] sm:$0xff]  ;;  %v42_v4 = vld [vmem:[%s694_s1 + $0x48] sm:$0xff]  ;;  %v41_v5 = vld [vmem:[%s694_s1 + $0x40] sm:$0xff] }
   0x3   :  { %378 = vmatpush3.msk.msra.mxu0 %vm96_vm0, %v46_v0  ;;  %443 = vmatpush3.msk.msra.mxu1 %vm96_vm0, %v46_v0  ;;  %v40_v6 = vld [vmem:[%s694_s1 + $0x38] sm:$0xff]  ;;  %v39_v7 = vld [vmem:[%s694_s1 + $0x30] sm:$0xff]  ;;  %v38_v8 = vld [vmem:[%s694_s1 + $0x28] sm:$0xff] }
   0x4   :  { %379 = vmatprep.subr.mxu0 %v45_v1  ;;  %430 = vmatprep.subr.mxu1 %v45_v1  ;;  %v37_v9 = vld [vmem:[%s694_s1 + $0x20] sm:$0xff]  ;;  %v36_v10 = vld [vmem:[%s694_s1 + $0x18] sm:$0xff]  ;;  %v35_v11 = vld [vmem:[%s694_s1 + $0x10] sm:$0xff] }
   0x5   :  { %380 = vmatpush3.msra.mxu0 %v45_v1  ;;  %444 = vmatpush3.msra.mxu1 %v45_v1  ;;  %v34_v12 = vld [vmem:[%s694_s1 + $0x8] sm:$0xff]  ;;  %v33_v13 = vld [vmem:[%s694_s1] sm:$0xff]  ;;  %v19_v18 = vld [vmem:[%s695_s0 + $0x10] sm:$0xff] }
   0x6   :  { %381 = vmatprep.subr.mxu0 %v44_v2  ;;  %431 = vmatprep.subr.mxu1 %v44_v2  ;;  %v17_v14 = vld [vmem:[%s695_s0] sm:$0xff]  ;;  %v18_v16 = vld [vmem:[%s695_s0 + $0x8] sm:$0xff]  ;;  %v27_v19 = vld [vmem:[%s695_s0 + $0x50] sm:$0xff] }
   0x7   :  { %382 = vmatpush3.msra.mxu0 %v44_v2  ;;  %445 = vmatpush3.msra.mxu1 %v44_v2  ;;  %v25_v15 = vld [vmem:[%s695_s0 + $0x40] sm:$0xff]  ;;  %v26_v17 = vld [vmem:[%s695_s0 + $0x48] sm:$0xff]  ;;  %v20_v20 = vld [vmem:[%s695_s0 + $0x18] sm:$0xff] }
   0x8   :  { %383 = vmatprep.subr.mxu0 %v43_v3  ;;  %432 = vmatprep.subr.mxu1 %v43_v3  ;;  %v28_v21 = vld [vmem:[%s695_s0 + $0x58] sm:$0xff]  ;;  %v21_v22 = vld [vmem:[%s695_s0 + $0x20] sm:$0xff]  ;;  %v22_v24 = vld [vmem:[%s695_s0 + $0x28] sm:$0xff] }
   0x9   :  { %384 = vmatpush3.msra.mxu0 %v43_v3  ;;  %446 = vmatpush3.msra.mxu1 %v43_v3  ;;  %v29_v23 = vld [vmem:[%s695_s0 + $0x60] sm:$0xff]  ;;  %v30_v25 = vld [vmem:[%s695_s0 + $0x68] sm:$0xff]  ;;  %v23_v26 = vld [vmem:[%s695_s0 + $0x30] sm:$0xff] }
   0xa   :  { %385 = vmatprep.subr.mxu0 %v42_v4  ;;  %433 = vmatprep.subr.mxu1 %v42_v4  ;;  %v31_v27 = vld [vmem:[%s695_s0 + $0x70] sm:$0xff]  ;;  %v24_v28 = vld [vmem:[%s695_s0 + $0x38] sm:$0xff]  ;;  %v591_v30 = vld [vmem:[%s696_s2] ss:$0 sm:$0xff] }
   0xb   :  { %386 = vmatpush3.msra.mxu0 %v42_v4  ;;  %447 = vmatpush3.msra.mxu1 %v42_v4  ;;  %v32_v29 = vld [vmem:[%s695_s0 + $0x78] sm:$0xff]  ;;  %v596_v32 = vld [vmem:[%s697_s3] ss:$0 sm:$0xff] }
   0xc   :  { %387 = vmatprep.subr.mxu0 %v41_v5  ;;  %434 = vmatprep.subr.mxu1 %v41_v5 }
   0xd   :  { %388 = vmatpush3.msra.mxu0 %v41_v5  ;;  %448 = vmatpush3.msra.mxu1 %v41_v5 }
   0xe   :  { %389 = vmatprep.subr.mxu0 %v40_v6  ;;  %435 = vmatprep.subr.mxu1 %v40_v6 }
   0xf   :  { %390 = vmatpush3.msra.mxu0 %v40_v6  ;;  %449 = vmatpush3.msra.mxu1 %v40_v6 }
  0x10   :  { %391 = vmatprep.subr.mxu0 %v39_v7  ;;  %436 = vmatprep.subr.mxu1 %v39_v7 }
  0x11   :  { %392 = vmatpush3.msra.mxu0 %v39_v7  ;;  %450 = vmatpush3.msra.mxu1 %v39_v7 }
  0x12   :  { %393 = vmatprep.subr.mxu0 %v38_v8  ;;  %437 = vmatprep.subr.mxu1 %v38_v8 }
  0x13   :  { %394 = vmatpush3.msra.mxu0 %v38_v8  ;;  %451 = vmatpush3.msra.mxu1 %v38_v8 }
  0x14   :  { %395 = vmatprep.subr.mxu0 %v37_v9  ;;  %438 = vmatprep.subr.mxu1 %v37_v9 }
  0x15   :  { %396 = vmatpush3.msra.mxu0 %v37_v9  ;;  %452 = vmatpush3.msra.mxu1 %v37_v9 }
  0x16   :  { %397 = vmatprep.subr.mxu0 %v36_v10  ;;  %439 = vmatprep.subr.mxu1 %v36_v10 }
  0x17   :  { %398 = vmatpush3.msra.mxu0 %v36_v10  ;;  %453 = vmatpush3.msra.mxu1 %v36_v10 }
  0x18   :  { %399 = vmatprep.subr.mxu0 %v35_v11  ;;  %440 = vmatprep.subr.mxu1 %v35_v11 }
  0x19   :  { %400 = vmatpush3.msra.mxu0 %v35_v11  ;;  %454 = vmatpush3.msra.mxu1 %v35_v11 }
  0x1a   :  { %401 = vmatprep.subr.mxu0 %v34_v12  ;;  %441 = vmatprep.subr.mxu1 %v34_v12 }
  0x1b   :  { %402 = vmatpush3.msra.mxu0 %v34_v12  ;;  %455 = vmatpush3.msra.mxu1 %v34_v12 }
  0x1c   :  { %403 = vmatprep.subr.mxu0 %v33_v13  ;;  %442 = vmatprep.subr.mxu1 %v33_v13 }
  0x1d   :  { %404 = vmatpush3.msra.mxu0 %v33_v13  ;;  %456 = vmatpush3.msra.mxu1 %v33_v13 }
  0x1e   :  { %405 = vmatprep.mubr.msk.f32.mxu0 %vm47_vm1, %v17_v14  ;;  %417 = vmatprep.mubr.msk.f32.mxu1 %vm47_vm1, %v25_v15 }
  0x1f   :  { %406 = vmatmul.mubr.msk.f32.vlgmr.msra.gmra.mxu0 %vm47_vm1, %v18_v16  ;;  %418 = vmatmul.mubr.msk.f32.vlgmr.msra.gmra.mxu1 %vm47_vm1, %v26_v17 }
  0x20   :  { %408 = vmatprep.mubr.msk.f32.mxu0 %vm47_vm1, %v19_v18  ;;  %420 = vmatprep.mubr.msk.f32.mxu1 %vm47_vm1, %v27_v19 }
  0x23   :  { %409 = vmatmul.mubr.msk.f32.gmra.mxu0 %vm47_vm1, %v20_v20  ;;  %421 = vmatmul.mubr.msk.f32.gmra.mxu1 %vm47_vm1, %v28_v21 }
  0x24   :  { %411 = vmatprep.mubr.msk.f32.mxu0 %vm47_vm1, %v21_v22  ;;  %423 = vmatprep.mubr.msk.f32.mxu1 %vm47_vm1, %v29_v23 }
  0x27   :  { %412 = vmatmul.mubr.msk.f32.gmra.mxu0 %vm47_vm1, %v22_v24  ;;  %424 = vmatmul.mubr.msk.f32.gmra.mxu1 %vm47_vm1, %v30_v25 }
  0x28   :  { %414 = vmatprep.mubr.msk.f32.mxu0 %vm47_vm1, %v23_v26  ;;  %426 = vmatprep.mubr.msk.f32.mxu1 %vm47_vm1, %v31_v27 }
  0x2b   :  { %415 = vmatmul.mubr.msk.f32.gmra.mxu0 %vm47_vm1, %v24_v28  ;;  %427 = vmatmul.mubr.msk.f32.gmra.mxu1 %vm47_vm1, %v32_v29 }
  0xdf   :  { %v407_v31 = vpop.f32.mrf.mxu0  ;;  %v419_v33 = vpop.f32.mrf.mxu1 }
  0xe0   :  { %v253_v34 = vmul.f32 %v407_v31, %v591_v30  ;;  %v261_v35 = vmul.f32 %v419_v33, %v591_v30 }
  0xe1   :  { %v166_v36 = vpop.f32.mrf.mxu0  ;;  %v206_v37 = vpop.f32.mrf.mxu1 }
  0xe2   :  { %v276_v38 = vadd.f32 %v596_v32, %v253_v34  ;;  %v284_v39 = vadd.f32 %v596_v32, %v261_v35  ;;  %v252_v40 = vmul.f32 %v591_v30, %v166_v36  ;;  %v260_v41 = vmul.f32 %v591_v30, %v206_v37 }
  0xe3   :  { %v410_v42 = vpop.f32.mrf.mxu0  ;;  %v422_v43 = vpop.f32.mrf.mxu1 }
  0xe4   :  { %v292_v44 = vmax.f32 %v276_v38, 0.0  ;;  %v300_v45 = vmax.f32 %v284_v39, 0.0  ;;  %v275_v46 = vadd.f32 %v596_v32, %v252_v40  ;;  %v283_v47 = vadd.f32 %v596_v32, %v260_v41 }
  0xe5   :  { %v255_v48 = vmul.f32 %v410_v42, %v591_v30  ;;  %v263_v49 = vmul.f32 %v422_v43, %v591_v30  ;;  %v176_v50 = vpop.f32.mrf.mxu0  ;;  %v216_v51 = vpop.f32.mrf.mxu1 }
  0xe6   :  { %309 = vst.msk [vmem:[%s698_s4 + $0x8] sm:$0xff] %vm307_vm2, %v292_v44  ;;  %317 = vst.msk [vmem:[%s698_s4 + $0x48] sm:$0xff] %vm307_vm2, %v300_v45  ;;  %v291_v52 = vmax.f32 %v275_v46, 0.0  ;;  %v299_v53 = vmax.f32 %v283_v47, 0.0  ;;  %v254_v54 = vmul.f32 %v591_v30, %v176_v50  ;;  %v262_v55 = vmul.f32 %v591_v30, %v216_v51 }
  0xe7   :  { %v278_v56 = vadd.f32 %v596_v32, %v255_v48  ;;  %v286_v57 = vadd.f32 %v596_v32, %v263_v49  ;;  %v413_v58 = vpop.f32.mrf.mxu0  ;;  %v425_v59 = vpop.f32.mrf.mxu1 }
  0xe8   :  { %308 = vst.msk [vmem:[%s698_s4] sm:$0xff] %vm307_vm2, %v291_v52  ;;  %316 = vst.msk [vmem:[%s698_s4 + $0x40] sm:$0xff] %vm307_vm2, %v299_v53  ;;  %v277_v60 = vadd.f32 %v596_v32, %v254_v54  ;;  %v285_v61 = vadd.f32 %v596_v32, %v262_v55  ;;  %v257_v62 = vmul.f32 %v413_v58, %v591_v30 }
  0xe9   :  { %v265_v63 = vmul.f32 %v425_v59, %v591_v30  ;;  %v294_v0 = vmax.f32 %v278_v56, 0.0  ;;  %v302_v1 = vmax.f32 %v286_v57, 0.0  ;;  %v186_v2 = vpop.f32.mrf.mxu0  ;;  %v226_v3 = vpop.f32.mrf.mxu1 }
  0xea   :  { %v293_v4 = vmax.f32 %v277_v60, 0.0  ;;  %v301_v5 = vmax.f32 %v285_v61, 0.0  ;;  %v280_v6 = vadd.f32 %v596_v32, %v257_v62  ;;  %v256_v8 = vmul.f32 %v591_v30, %v186_v2 }
  0xeb   :  { %v288_v7 = vadd.f32 %v596_v32, %v265_v63  ;;  %311 = vst.msk [vmem:[%s698_s4 + $0x18] sm:$0xff] %vm307_vm2, %v294_v0  ;;  %319 = vst.msk [vmem:[%s698_s4 + $0x58] sm:$0xff] %vm307_vm2, %v302_v1  ;;  %v264_v9 = vmul.f32 %v591_v30, %v226_v3  ;;  %v416_v10 = vpop.f32.mrf.mxu0  ;;  %v428_v11 = vpop.f32.mrf.mxu1 }
  0xec   :  { %310 = vst.msk [vmem:[%s698_s4 + $0x10] sm:$0xff] %vm307_vm2, %v293_v4  ;;  %318 = vst.msk [vmem:[%s698_s4 + $0x50] sm:$0xff] %vm307_vm2, %v301_v5  ;;  %v296_v12 = vmax.f32 %v280_v6, 0.0  ;;  %v259_v14 = vmul.f32 %v416_v10, %v591_v30  ;;  %v267_v15 = vmul.f32 %v428_v11, %v591_v30  ;;  %v279_v16 = vadd.f32 %v596_v32, %v256_v8 }
  0xed   :  { %v304_v13 = vmax.f32 %v288_v7, 0.0  ;;  %v287_v17 = vadd.f32 %v596_v32, %v264_v9  ;;  %v196_v18 = vpop.f32.mrf.mxu0  ;;  %v236_v19 = vpop.f32.mrf.mxu1 }
  0xee   :  { %313 = vst.msk [vmem:[%s698_s4 + $0x28] sm:$0xff] %vm307_vm2, %v296_v12  ;;  %v282_v20 = vadd.f32 %v596_v32, %v259_v14  ;;  %v290_v21 = vadd.f32 %v596_v32, %v267_v15  ;;  %v258_v22 = vmul.f32 %v591_v30, %v196_v18  ;;  %v266_v23 = vmul.f32 %v591_v30, %v236_v19 }
  0xef   :  { %321 = vst.msk [vmem:[%s698_s4 + $0x68] sm:$0xff] %vm307_vm2, %v304_v13  ;;  %v295_v24 = vmax.f32 %v279_v16, 0.0  ;;  %v303_v25 = vmax.f32 %v287_v17, 0.0 }
  0xf0   :  { %v298_v26 = vmax.f32 %v282_v20, 0.0  ;;  %v306_v27 = vmax.f32 %v290_v21, 0.0  ;;  %v281_v28 = vadd.f32 %v596_v32, %v258_v22  ;;  %v289_v29 = vadd.f32 %v596_v32, %v266_v23 }
  0xf1   :  { %312 = vst.msk [vmem:[%s698_s4 + $0x20] sm:$0xff] %vm307_vm2, %v295_v24  ;;  %320 = vst.msk [vmem:[%s698_s4 + $0x60] sm:$0xff] %vm307_vm2, %v303_v25 }
  0xf2   :  { %315 = vst.msk [vmem:[%s698_s4 + $0x38] sm:$0xff] %vm307_vm2, %v298_v26  ;;  %323 = vst.msk [vmem:[%s698_s4 + $0x78] sm:$0xff] %vm307_vm2, %v306_v27  ;;  %v297_v30 = vmax.f32 %v281_v28, 0.0  ;;  %v305_v31 = vmax.f32 %v289_v29, 0.0 }
  0xf4   :  { %314 = vst.msk [vmem:[%s698_s4 + $0x30] sm:$0xff] %vm307_vm2, %v297_v30  ;;  %322 = vst.msk [vmem:[%s698_s4 + $0x70] sm:$0xff] %vm307_vm2, %v305_v31 }

// kernel: basic_block_forward.6
= control target key start
LH: loop header
LB: loop body
LE: loop exit
PB: predicated region body
PF: predicated region fallthrough
CT: control target
= control target key end

     0   :  { %v410_v0 = vmov 0.0   ;;  %vm76_vm0 = vcmask 719872   ;;  %vm316_vm1 = vcmask 64512   ;;  %s789_s1 = inlined_call_operand.vmem [shape: f32[216,8], index: 1, kind: input, shape index: {}]   ;;  %s790_s0 = inlined_call_operand.vmem [shape: f32[128,216], index: 0, kind: input, shape index: {}]   ;;  %s791_s2 = inlined_call_operand.vmem [shape: f32[1,8], index: 2, kind: input, shape index: {}]   ;;  %s792_s3 = inlined_call_operand.vmem [shape: f32[1,8], index: 3, kind: input, shape index: {}]   ;;  %s793_s4 = inlined_call_operand.vmem [shape: f32[128,8], index: 4, kind: output, shape index: {}]  }
   0x1   :  { %125 = vmatprep.subr.mxu0 %v410_v0  ;;  %355 = vmatprep.subr.mxu1 %v410_v0  ;;  %v64_v1 = vld [vmem:[%s789_s1 + $0x78] sm:$0xff]  ;;  %v63_v2 = vld [vmem:[%s789_s1 + $0x70] sm:$0xff]  ;;  %v62_v3 = vld [vmem:[%s789_s1 + $0x68] sm:$0xff] }
   0x2   :  { %126 = vmatpush1.msra.mxu0 %v64_v1  ;;  %382 = vmatpush1.msra.mxu1 %v64_v1  ;;  %v61_v4 = vld [vmem:[%s789_s1 + $0x60] sm:$0xff]  ;;  %v60_v5 = vld [vmem:[%s789_s1 + $0x58] sm:$0xff]  ;;  %v59_v6 = vld [vmem:[%s789_s1 + $0x50] sm:$0xff] }
   0x3   :  { %127 = vmatprep.subr.mxu0 %v410_v0  ;;  %356 = vmatprep.subr.mxu1 %v410_v0  ;;  %v58_v7 = vld [vmem:[%s789_s1 + $0x48] sm:$0xff]  ;;  %v57_v8 = vld [vmem:[%s789_s1 + $0x40] sm:$0xff]  ;;  %v56_v9 = vld [vmem:[%s789_s1 + $0x38] sm:$0xff] }
   0x4   :  { %128 = vmatpush1.msra.mxu0 %v63_v2  ;;  %383 = vmatpush1.msra.mxu1 %v63_v2  ;;  %v55_v10 = vld [vmem:[%s789_s1 + $0x30] sm:$0xff]  ;;  %v54_v11 = vld [vmem:[%s789_s1 + $0x28] sm:$0xff]  ;;  %v53_v12 = vld [vmem:[%s789_s1 + $0x20] sm:$0xff] }
   0x5   :  { %129 = vmatprep.subr.mxu0 %v410_v0  ;;  %357 = vmatprep.subr.mxu1 %v410_v0  ;;  %v52_v13 = vld [vmem:[%s789_s1 + $0x18] sm:$0xff]  ;;  %v51_v14 = vld [vmem:[%s789_s1 + $0x10] sm:$0xff]  ;;  %v50_v15 = vld [vmem:[%s789_s1 + $0x8] sm:$0xff] }
   0x6   :  { %130 = vmatpush1.msra.mxu0 %v62_v3  ;;  %384 = vmatpush1.msra.mxu1 %v62_v3  ;;  %v49_v16 = vld [vmem:[%s789_s1] sm:$0xff]  ;;  %v75_v17 = vld [vmem:[%s789_s1 + $0xd0] sm:$0xff]  ;;  %v74_v18 = vld [vmem:[%s789_s1 + $0xc8] sm:$0xff] }
   0x7   :  { %131 = vmatprep.subr.mxu0 %v410_v0  ;;  %358 = vmatprep.subr.mxu1 %v410_v0  ;;  %v73_v19 = vld [vmem:[%s789_s1 + $0xc0] sm:$0xff]  ;;  %v72_v20 = vld [vmem:[%s789_s1 + $0xb8] sm:$0xff]  ;;  %v71_v21 = vld [vmem:[%s789_s1 + $0xb0] sm:$0xff] }
   0x8   :  { %132 = vmatpush1.msra.mxu0 %v61_v4  ;;  %385 = vmatpush1.msra.mxu1 %v61_v4  ;;  %v70_v22 = vld [vmem:[%s789_s1 + $0xa8] sm:$0xff]  ;;  %v69_v23 = vld [vmem:[%s789_s1 + $0xa0] sm:$0xff]  ;;  %v68_v24 = vld [vmem:[%s789_s1 + $0x98] sm:$0xff] }
   0x9   :  { %133 = vmatprep.subr.mxu0 %v410_v0  ;;  %359 = vmatprep.subr.mxu1 %v410_v0  ;;  %v67_v25 = vld [vmem:[%s789_s1 + $0x90] sm:$0xff]  ;;  %v66_v26 = vld [vmem:[%s789_s1 + $0x88] sm:$0xff]  ;;  %v65_v27 = vld [vmem:[%s789_s1 + $0x80] sm:$0xff] }
   0xa   :  { %134 = vmatpush1.msra.mxu0 %v60_v5  ;;  %386 = vmatpush1.msra.mxu1 %v60_v5  ;;  %v18_v28 = vld [vmem:[%s790_s0 + $0x8] sm:$0xff]  ;;  %v17_v30 = vld [vmem:[%s790_s0] sm:$0xff]  ;;  %v20_v32 = vld [vmem:[%s790_s0 + $0x18] sm:$0xff] }
   0xb   :  { %135 = vmatprep.subr.mxu0 %v410_v0  ;;  %360 = vmatprep.subr.mxu1 %v410_v0  ;;  %v34_v29 = vld [vmem:[%s790_s0 + $0x88] sm:$0xff]  ;;  %v33_v31 = vld [vmem:[%s790_s0 + $0x80] sm:$0xff]  ;;  %v36_v33 = vld [vmem:[%s790_s0 + $0x98] sm:$0xff] }
   0xc   :  { %136 = vmatpush1.msra.mxu0 %v59_v6  ;;  %387 = vmatpush1.msra.mxu1 %v59_v6  ;;  %v19_v34 = vld [vmem:[%s790_s0 + $0x10] sm:$0xff]  ;;  %v22_v36 = vld [vmem:[%s790_s0 + $0x28] sm:$0xff]  ;;  %v21_v38 = vld [vmem:[%s790_s0 + $0x20] sm:$0xff] }
   0xd   :  { %137 = vmatprep.subr.mxu0 %v410_v0  ;;  %361 = vmatprep.subr.mxu1 %v410_v0  ;;  %v35_v35 = vld [vmem:[%s790_s0 + $0x90] sm:$0xff]  ;;  %v38_v37 = vld [vmem:[%s790_s0 + $0xa8] sm:$0xff]  ;;  %v37_v39 = vld [vmem:[%s790_s0 + $0xa0] sm:$0xff] }
   0xe   :  { %138 = vmatpush1.msra.mxu0 %v58_v7  ;;  %388 = vmatpush1.msra.mxu1 %v58_v7  ;;  %v24_v40 = vld [vmem:[%s790_s0 + $0x38] sm:$0xff]  ;;  %v23_v42 = vld [vmem:[%s790_s0 + $0x30] sm:$0xff]  ;;  %v26_v44 = vld [vmem:[%s790_s0 + $0x48] sm:$0xff] }
   0xf   :  { %139 = vmatprep.subr.mxu0 %v410_v0  ;;  %362 = vmatprep.subr.mxu1 %v410_v0  ;;  %v40_v41 = vld [vmem:[%s790_s0 + $0xb8] sm:$0xff]  ;;  %v39_v43 = vld [vmem:[%s790_s0 + $0xb0] sm:$0xff]  ;;  %v42_v45 = vld [vmem:[%s790_s0 + $0xc8] sm:$0xff] }
  0x10   :  { %140 = vmatpush1.msra.mxu0 %v57_v8  ;;  %389 = vmatpush1.msra.mxu1 %v57_v8  ;;  %v25_v46 = vld [vmem:[%s790_s0 + $0x40] sm:$0xff]  ;;  %v28_v48 = vld [vmem:[%s790_s0 + $0x58] sm:$0xff]  ;;  %v27_v50 = vld [vmem:[%s790_s0 + $0x50] sm:$0xff] }
  0x11   :  { %141 = vmatprep.subr.mxu0 %v410_v0  ;;  %363 = vmatprep.subr.mxu1 %v410_v0  ;;  %v41_v47 = vld [vmem:[%s790_s0 + $0xc0] sm:$0xff]  ;;  %v44_v49 = vld [vmem:[%s790_s0 + $0xd8] sm:$0xff]  ;;  %v43_v51 = vld [vmem:[%s790_s0 + $0xd0] sm:$0xff] }
  0x12   :  { %142 = vmatpush1.msra.mxu0 %v56_v9  ;;  %390 = vmatpush1.msra.mxu1 %v56_v9  ;;  %v30_v52 = vld [vmem:[%s790_s0 + $0x68] sm:$0xff]  ;;  %v29_v54 = vld [vmem:[%s790_s0 + $0x60] sm:$0xff]  ;;  %v32_v56 = vld [vmem:[%s790_s0 + $0x78] sm:$0xff] }
  0x13   :  { %143 = vmatprep.subr.mxu0 %v410_v0  ;;  %364 = vmatprep.subr.mxu1 %v410_v0  ;;  %v46_v53 = vld [vmem:[%s790_s0 + $0xe8] sm:$0xff]  ;;  %v45_v55 = vld [vmem:[%s790_s0 + $0xe0] sm:$0xff]  ;;  %v48_v57 = vld [vmem:[%s790_s0 + $0xf8] sm:$0xff] }
  0x14   :  { %144 = vmatpush1.msra.mxu0 %v55_v10  ;;  %391 = vmatpush1.msra.mxu1 %v55_v10  ;;  %v31_v58 = vld [vmem:[%s790_s0 + $0x70] sm:$0xff]  ;;  %v686_v60 = vld [vmem:[%s791_s2] ss:$0 sm:$0xff] }
  0x15   :  { %145 = vmatprep.subr.mxu0 %v410_v0  ;;  %365 = vmatprep.subr.mxu1 %v410_v0  ;;  %v47_v59 = vld [vmem:[%s790_s0 + $0xf0] sm:$0xff]  ;;  %v691_v62 = vld [vmem:[%s792_s3] ss:$0 sm:$0xff] }
  0x16   :  { %146 = vmatpush1.msra.mxu0 %v54_v11  ;;  %392 = vmatpush1.msra.mxu1 %v54_v11 }
  0x17   :  { %147 = vmatprep.subr.mxu0 %v410_v0  ;;  %366 = vmatprep.subr.mxu1 %v410_v0 }
  0x18   :  { %148 = vmatpush1.msra.mxu0 %v53_v12  ;;  %393 = vmatpush1.msra.mxu1 %v53_v12 }
  0x19   :  { %149 = vmatprep.subr.mxu0 %v410_v0  ;;  %367 = vmatprep.subr.mxu1 %v410_v0 }
  0x1a   :  { %150 = vmatpush1.msra.mxu0 %v52_v13  ;;  %394 = vmatpush1.msra.mxu1 %v52_v13 }
  0x1b   :  { %151 = vmatprep.subr.mxu0 %v410_v0  ;;  %368 = vmatprep.subr.mxu1 %v410_v0 }
  0x1c   :  { %152 = vmatpush1.msra.mxu0 %v51_v14  ;;  %395 = vmatpush1.msra.mxu1 %v51_v14 }
  0x1d   :  { %153 = vmatprep.subr.mxu0 %v410_v0  ;;  %369 = vmatprep.subr.mxu1 %v410_v0 }
  0x1e   :  { %154 = vmatpush1.msra.mxu0 %v50_v15  ;;  %396 = vmatpush1.msra.mxu1 %v50_v15 }
  0x1f   :  { %155 = vmatprep.subr.mxu0 %v410_v0  ;;  %370 = vmatprep.subr.mxu1 %v410_v0 }
  0x20   :  { %156 = vmatpush1.msra.mxu0 %v49_v16  ;;  %397 = vmatpush1.msra.mxu1 %v49_v16 }
  0x21   :  { %167 = vmatprep.subr.mxu0 %v410_v0  ;;  %371 = vmatprep.subr.mxu1 %v410_v0 }
  0x22   :  { %168 = vmatpush2.msra.mxu0 %v75_v17  ;;  %398 = vmatpush2.msra.mxu1 %v75_v17 }
  0x23   :  { %169 = vmatprep.subr.mxu0 %v410_v0  ;;  %372 = vmatprep.subr.mxu1 %v410_v0 }
  0x24   :  { %170 = vmatpush2.msra.mxu0 %v74_v18  ;;  %399 = vmatpush2.msra.mxu1 %v74_v18 }
  0x25   :  { %171 = vmatprep.subr.mxu0 %v410_v0  ;;  %373 = vmatprep.subr.mxu1 %v410_v0 }
  0x26   :  { %172 = vmatpush2.msra.mxu0 %v73_v19  ;;  %400 = vmatpush2.msra.mxu1 %v73_v19 }
  0x27   :  { %173 = vmatprep.subr.mxu0 %v410_v0  ;;  %374 = vmatprep.subr.mxu1 %v410_v0 }
  0x28   :  { %174 = vmatpush2.msra.mxu0 %v72_v20  ;;  %401 = vmatpush2.msra.mxu1 %v72_v20 }
  0x29   :  { %175 = vmatprep.subr.mxu0 %v410_v0  ;;  %375 = vmatprep.subr.mxu1 %v410_v0 }
  0x2a   :  { %176 = vmatpush2.msra.mxu0 %v71_v21  ;;  %402 = vmatpush2.msra.mxu1 %v71_v21 }
  0x2b   :  { %177 = vmatprep.subr.mxu0 %v410_v0  ;;  %376 = vmatprep.subr.mxu1 %v410_v0 }
  0x2c   :  { %178 = vmatpush2.msra.mxu0 %v70_v22  ;;  %403 = vmatpush2.msra.mxu1 %v70_v22 }
  0x2d   :  { %179 = vmatprep.subr.mxu0 %v410_v0  ;;  %377 = vmatprep.subr.mxu1 %v410_v0 }
  0x2e   :  { %180 = vmatpush2.msra.mxu0 %v69_v23  ;;  %404 = vmatpush2.msra.mxu1 %v69_v23 }
  0x2f   :  { %181 = vmatprep.subr.mxu0 %v410_v0  ;;  %378 = vmatprep.subr.mxu1 %v410_v0 }
  0x30   :  { %182 = vmatpush2.msra.mxu0 %v68_v24  ;;  %405 = vmatpush2.msra.mxu1 %v68_v24 }
  0x31   :  { %183 = vmatprep.subr.mxu0 %v410_v0  ;;  %379 = vmatprep.subr.mxu1 %v410_v0 }
  0x32   :  { %184 = vmatpush2.msra.mxu0 %v67_v25  ;;  %406 = vmatpush2.msra.mxu1 %v67_v25 }
  0x33   :  { %185 = vmatprep.subr.mxu0 %v410_v0  ;;  %380 = vmatprep.subr.mxu1 %v410_v0 }
  0x34   :  { %186 = vmatpush2.msra.mxu0 %v66_v26  ;;  %407 = vmatpush2.msra.mxu1 %v66_v26 }
  0x35   :  { %187 = vmatprep.subr.mxu0 %v410_v0  ;;  %381 = vmatprep.subr.mxu1 %v410_v0 }
  0x36   :  { %188 = vmatpush2.msra.mxu0 %v65_v27  ;;  %408 = vmatpush2.msra.mxu1 %v65_v27 }
  0x37   :  { %337 = vmatprep.mubr.msk.f32.mxu0 %vm76_vm0, %v18_v28  ;;  %345 = vmatprep.mubr.msk.f32.mxu1 %vm76_vm0, %v34_v29 }
  0x38   :  { %190 = vmatmul.mubr.f32.vlgmr.msra.gmra.mxu0 %v17_v30  ;;  %230 = vmatmul.mubr.f32.vlgmr.msra.gmra.mxu1 %v33_v31 }
  0x39   :  { %338 = vmatprep.mubr.msk.f32.mxu0 %vm76_vm0, %v20_v32  ;;  %346 = vmatprep.mubr.msk.f32.mxu1 %vm76_vm0, %v36_v33 }
  0x3c   :  { %195 = vmatmul.mubr.f32.gmra.mxu0 %v19_v34  ;;  %235 = vmatmul.mubr.f32.gmra.mxu1 %v35_v35 }
  0x3d   :  { %339 = vmatprep.mubr.msk.f32.mxu0 %vm76_vm0, %v22_v36  ;;  %347 = vmatprep.mubr.msk.f32.mxu1 %vm76_vm0, %v38_v37 }
  0x40   :  { %200 = vmatmul.mubr.f32.gmra.mxu0 %v21_v38  ;;  %240 = vmatmul.mubr.f32.gmra.mxu1 %v37_v39 }
  0x41   :  { %340 = vmatprep.mubr.msk.f32.mxu0 %vm76_vm0, %v24_v40  ;;  %348 = vmatprep.mubr.msk.f32.mxu1 %vm76_vm0, %v40_v41 }
  0x44   :  { %205 = vmatmul.mubr.f32.gmra.mxu0 %v23_v42  ;;  %245 = vmatmul.mubr.f32.gmra.mxu1 %v39_v43 }
  0x45   :  { %341 = vmatprep.mubr.msk.f32.mxu0 %vm76_vm0, %v26_v44  ;;  %349 = vmatprep.mubr.msk.f32.mxu1 %vm76_vm0, %v42_v45 }
  0x48   :  { %210 = vmatmul.mubr.f32.gmra.mxu0 %v25_v46  ;;  %250 = vmatmul.mubr.f32.gmra.mxu1 %v41_v47 }
  0x49   :  { %342 = vmatprep.mubr.msk.f32.mxu0 %vm76_vm0, %v28_v48  ;;  %350 = vmatprep.mubr.msk.f32.mxu1 %vm76_vm0, %v44_v49 }
  0x4c   :  { %215 = vmatmul.mubr.f32.gmra.mxu0 %v27_v50  ;;  %255 = vmatmul.mubr.f32.gmra.mxu1 %v43_v51 }
  0x4d   :  { %343 = vmatprep.mubr.msk.f32.mxu0 %vm76_vm0, %v30_v52  ;;  %351 = vmatprep.mubr.msk.f32.mxu1 %vm76_vm0, %v46_v53 }
  0x50   :  { %220 = vmatmul.mubr.f32.gmra.mxu0 %v29_v54  ;;  %260 = vmatmul.mubr.f32.gmra.mxu1 %v45_v55 }
  0x51   :  { %344 = vmatprep.mubr.msk.f32.mxu0 %vm76_vm0, %v32_v56  ;;  %352 = vmatprep.mubr.msk.f32.mxu1 %vm76_vm0, %v48_v57 }
  0x54   :  { %225 = vmatmul.mubr.f32.gmra.mxu0 %v31_v58  ;;  %265 = vmatmul.mubr.f32.gmra.mxu1 %v47_v59 }
  0xf8   :  { %v191_v61 = vpop.f32.mrf.mxu0  ;;  %v231_v63 = vpop.f32.mrf.mxu1 }
  0xf9   :  { %v277_v0 = vmul.f32 %v686_v60, %v191_v61  ;;  %v285_v1 = vmul.f32 %v686_v60, %v231_v63 }
  0xfa   :  { %v193_v2 = vpop.f32.mrf.mxu0  ;;  %v233_v3 = vpop.f32.mrf.mxu1 }
  0xfb   :  { %v300_v4 = vadd.f32 %v691_v62, %v277_v0  ;;  %v308_v5 = vadd.f32 %v691_v62, %v285_v1 }
  0xfc   :  { %v196_v6 = vpop.f32.mrf.mxu0  ;;  %v236_v7 = vpop.f32.mrf.mxu1 }
  0xfd   :  { %317 = vst.msk [vmem:[%s793_s4] sm:$0xff] %vm316_vm1, %v300_v4  ;;  %325 = vst.msk [vmem:[%s793_s4 + $0x40] sm:$0xff] %vm316_vm1, %v308_v5  ;;  %v278_v8 = vmul.f32 %v686_v60, %v196_v6  ;;  %v286_v9 = vmul.f32 %v686_v60, %v236_v7 }
  0xfe   :  { %v198_v10 = vpop.f32.mrf.mxu0  ;;  %v238_v11 = vpop.f32.mrf.mxu1 }
  0xff   :  { %v301_v12 = vadd.f32 %v691_v62, %v278_v8  ;;  %v309_v13 = vadd.f32 %v691_v62, %v286_v9 }
 0x100   :  { %v201_v14 = vpop.f32.mrf.mxu0  ;;  %v241_v15 = vpop.f32.mrf.mxu1 }
 0x101   :  { %318 = vst.msk [vmem:[%s793_s4 + $0x8] sm:$0xff] %vm316_vm1, %v301_v12  ;;  %326 = vst.msk [vmem:[%s793_s4 + $0x48] sm:$0xff] %vm316_vm1, %v309_v13  ;;  %v279_v16 = vmul.f32 %v686_v60, %v201_v14  ;;  %v287_v17 = vmul.f32 %v686_v60, %v241_v15 }
 0x102   :  { %v203_v18 = vpop.f32.mrf.mxu0  ;;  %v243_v19 = vpop.f32.mrf.mxu1 }
 0x103   :  { %v302_v20 = vadd.f32 %v691_v62, %v279_v16  ;;  %v310_v21 = vadd.f32 %v691_v62, %v287_v17 }
 0x104   :  { %v206_v22 = vpop.f32.mrf.mxu0  ;;  %v246_v23 = vpop.f32.mrf.mxu1 }
 0x105   :  { %319 = vst.msk [vmem:[%s793_s4 + $0x10] sm:$0xff] %vm316_vm1, %v302_v20  ;;  %327 = vst.msk [vmem:[%s793_s4 + $0x50] sm:$0xff] %vm316_vm1, %v310_v21  ;;  %v280_v24 = vmul.f32 %v686_v60, %v206_v22  ;;  %v288_v25 = vmul.f32 %v686_v60, %v246_v23 }
 0x106   :  { %v208_v26 = vpop.f32.mrf.mxu0  ;;  %v248_v27 = vpop.f32.mrf.mxu1 }
 0x107   :  { %v303_v28 = vadd.f32 %v691_v62, %v280_v24  ;;  %v311_v29 = vadd.f32 %v691_v62, %v288_v25 }
 0x108   :  { %v211_v30 = vpop.f32.mrf.mxu0  ;;  %v251_v31 = vpop.f32.mrf.mxu1 }
 0x109   :  { %320 = vst.msk [vmem:[%s793_s4 + $0x18] sm:$0xff] %vm316_vm1, %v303_v28  ;;  %328 = vst.msk [vmem:[%s793_s4 + $0x58] sm:$0xff] %vm316_vm1, %v311_v29  ;;  %v281_v32 = vmul.f32 %v686_v60, %v211_v30  ;;  %v289_v33 = vmul.f32 %v686_v60, %v251_v31 }
 0x10a   :  { %v213_v34 = vpop.f32.mrf.mxu0  ;;  %v253_v35 = vpop.f32.mrf.mxu1 }
 0x10b   :  { %v304_v36 = vadd.f32 %v691_v62, %v281_v32  ;;  %v312_v37 = vadd.f32 %v691_v62, %v289_v33 }
 0x10c   :  { %v216_v38 = vpop.f32.mrf.mxu0  ;;  %v256_v39 = vpop.f32.mrf.mxu1 }
 0x10d   :  { %321 = vst.msk [vmem:[%s793_s4 + $0x20] sm:$0xff] %vm316_vm1, %v304_v36  ;;  %329 = vst.msk [vmem:[%s793_s4 + $0x60] sm:$0xff] %vm316_vm1, %v312_v37  ;;  %v282_v40 = vmul.f32 %v686_v60, %v216_v38  ;;  %v290_v41 = vmul.f32 %v686_v60, %v256_v39 }
 0x10e   :  { %v218_v42 = vpop.f32.mrf.mxu0  ;;  %v258_v43 = vpop.f32.mrf.mxu1 }
 0x10f   :  { %v305_v44 = vadd.f32 %v691_v62, %v282_v40  ;;  %v313_v45 = vadd.f32 %v691_v62, %v290_v41 }
 0x110   :  { %v221_v46 = vpop.f32.mrf.mxu0  ;;  %v261_v47 = vpop.f32.mrf.mxu1 }
 0x111   :  { %322 = vst.msk [vmem:[%s793_s4 + $0x28] sm:$0xff] %vm316_vm1, %v305_v44  ;;  %330 = vst.msk [vmem:[%s793_s4 + $0x68] sm:$0xff] %vm316_vm1, %v313_v45  ;;  %v283_v48 = vmul.f32 %v686_v60, %v221_v46  ;;  %v291_v49 = vmul.f32 %v686_v60, %v261_v47 }
 0x112   :  { %v223_v50 = vpop.f32.mrf.mxu0  ;;  %v263_v51 = vpop.f32.mrf.mxu1 }
 0x113   :  { %v306_v52 = vadd.f32 %v691_v62, %v283_v48  ;;  %v314_v53 = vadd.f32 %v691_v62, %v291_v49 }
 0x114   :  { %v226_v54 = vpop.f32.mrf.mxu0  ;;  %v266_v55 = vpop.f32.mrf.mxu1 }
 0x115   :  { %323 = vst.msk [vmem:[%s793_s4 + $0x30] sm:$0xff] %vm316_vm1, %v306_v52  ;;  %331 = vst.msk [vmem:[%s793_s4 + $0x70] sm:$0xff] %vm316_vm1, %v314_v53  ;;  %v284_v56 = vmul.f32 %v686_v60, %v226_v54  ;;  %v292_v57 = vmul.f32 %v686_v60, %v266_v55 }
 0x116   :  { %v228_v58 = vpop.f32.mrf.mxu0  ;;  %v268_v59 = vpop.f32.mrf.mxu1 }
 0x117   :  { %v307_v61 = vadd.f32 %v691_v62, %v284_v56  ;;  %v315_v63 = vadd.f32 %v691_v62, %v292_v57 }
 0x119   :  { %324 = vst.msk [vmem:[%s793_s4 + $0x38] sm:$0xff] %vm316_vm1, %v307_v61  ;;  %332 = vst.msk [vmem:[%s793_s4 + $0x78] sm:$0xff] %vm316_vm1, %v315_v63 }

// kernel: basic_block_forward.7
= control target key start
LH: loop header
LB: loop body
LE: loop exit
PB: predicated region body
PF: predicated region fallthrough
CT: control target
= control target key end

     0   :  { %11 = vsyncpa [#allocation3], 0  ;;  %s945_s0 = inlined_call_operand.vmem [shape: f32[2,64,8], index: 0, kind: input, shape index: {}]   ;;  %s946_s1 = inlined_call_operand.vmem [shape: f32[2,64,8], index: 1, kind: input, shape index: {}]   ;;  %s947_s2 = inlined_call_operand.vmem [shape: f32[8,2], index: 2, kind: input, shape index: {}]   ;;  %s948_s3 = inlined_call_operand.vmem [shape: f32[1,2], index: 3, kind: input, shape index: {}]   ;;  %s949_s4 = inlined_call_operand.vmem [shape: f32[2,8], index: 4, kind: input, shape index: {}]   ;;  %s950_s5 = inlined_call_operand.vmem [shape: f32[1,8], index: 5, kind: input, shape index: {}]   ;;  %s951_s6 = inlined_call_operand.hbm [shape: f32[2,64,8], index: 6, kind: output, shape index: {}]  }
   0x1   :  { %13 = vsyncpa [#allocation3 + $0x1], 0  ;;  %s780_s21 = smov 0   ;;  %s782_s22 = smov 0  }
   0x2   :  { %s784_s23 = smov 0   ;;  %s786_s24 = smov 0  }
   0x3 LB: > { %s801_s25 = sadd.s32 4294967295, %s738_s24   ;;  %s596_s26 = sadd.s32 4294967294, %s738_s24   ;;  %s738_s24 = sphi %s786_s24, %s957_s24   ;;  %s734_s23 = sphi %s784_s23, %s956_s23   ;;  %s730_s22 = sphi %s782_s22, %s955_s22   ;;  %s726_s21 = sphi %s780_s21, %s954_s21  }
   0x4   : > { %s805_s27 = sadd.s32 1, %s738_s24   ;;  %s162_s28 = sadd.s32 1, %s734_s23 }
   0x5   : > { %s159_s29 = ssub.s32 %s738_s24, %s805_s27  ;;  %p172_p0 = scmp.ne.s32.totalorder %s734_s23, %s730_s22 }
   0x6   : > { %p160_p1 = scmp.eq.s32.totalorder %s159_s29, 0  ;;  %p173_p2 = scmp.eq.s32.totalorder %s801_s25, 1 }
   0x7   : > { %p178_p3 = scmp.ne.s32.totalorder %s730_s22, %s726_s21  ;;  %p179_p4 = scmp.eq.s32.totalorder %s596_s26, 1 }
   0x8   : > { %s816_s30 = scalar_select %p160_p1, %s734_s23, %s162_s28  }
   0x9   : > { %p818_p5 = por %p173_p2, %p172_p0  ;;  %p822_p6 = por %p179_p4, %p178_p3 }
   0xa   : > { %p599_p7 = scmp.ge.s32.totalorder %s738_s24, 1  ;;  %p225_p8 = scmp.lt.s32.totalorder %s738_s24, 3 }
   0xc   : > { %p226_p9 = pnand %p599_p7, %p225_p8 }
   0xd   : > { %p260_p10 = scmp.lt.s32.totalorder (!%p226_p9), %s801_s25, 1  ;;  %s257_s28 = sand.u32 (!%p226_p9), 1, %s730_s22  }
   0xe   : > { %229 = sbr.rel (%p226_p9) target bundleno = 502 (0x1f6), region = 44  ;;  %s600_s13 = sshll.u32 (!%p226_p9), %s257_s28, 6 }
   0xf   : > { %s742_s19 = smov (!%p226_p9), [#allocation2]  }
  0x10   : > { %s682_s20 = sshll.u32 (!%p226_p9), %s742_s19, 4  ;;  %s683_s20 = int_to_ptr.vmem [resolvable:$false] %s682_s20 }
  0x11   : > { %s684_s26 = scalar_lea.vmem (!%p226_p9), %s683_s20, 2048 }
  0x13   : > { %v302_v0 = vld [vmem:[%s947_s2] sm:$0xff]  ;;  %v740_v1 = vmov 0.0   ;;  %vm741_vm0 = vmmov 0   ;;  %s833_s11 = scalar_select %p260_p10, %s801_s25, 1  ;;  %vm278_vm1 = vcmask 64512   ;;  %vm384_vm2 = vcmask 1041408  }
  0x14   : > { %621 = vmatprep.subr.mxu0 %v740_v1  ;;  %623 = vmatprep.mubr.msk.f32.mxu0 %vm741_vm0, %v740_v1  ;;  %v378_v32 = vld [vmem:[%s949_s4] sm:$0x3]  ;;  %vm380_vm3 = vcmask 15360   ;;  %v464_v45 = vlaneseq }
  0x15   : > { %622 = vmatpush3.msra.mxu0 %v302_v0  ;;  %626 = vmatprep.subr.mxu1 %v740_v1  ;;  %s614_s12 = sshll.u32 %s833_s11, 6  ;;  %v303_v33 = vld [vmem:[%s948_s3] sm:$0x1]  ;;  %s616_s11 = sshll.u32 %s801_s25, 10 }
  0x16   : > { %628 = vmatprep.mubr.msk.f32.mxu1 %vm741_vm0, %v740_v1  ;;  %s264_s15 = scalar_lea.vmem %s945_s0, %s614_s12  ;;  %627 = vmatpush3.msk.msra.mxu1 %vm384_vm2, %v378_v32  ;;  %v379_v38 = vld [vmem:[%s950_s5] sm:$0x1]  ;;  %v465_v46 = vshrl.u32 %v464_v45, 7  ;;  %s269_s10 = scalar_lea.vmem %s946_s1, %s614_s12 }
  0x17   : > { %v841_v2 = vld [vmem:[%s264_s15] sm:$0xff]  ;;  %v843_v3 = vld [vmem:[%s264_s15 + $0x8] sm:$0xff]  ;;  %v845_v4 = vld [vmem:[%s264_s15 + $0x10] sm:$0xff]  ;;  %s259_s12 = scalar_lea.vmem [#allocation2], %s600_s13  ;;  %s891_s17 = scalar_lea.hbm %s951_s6, %s616_s11 }
  0x18   : > { %v847_v5 = vld [vmem:[%s264_s15 + $0x18] sm:$0xff]  ;;  %v279_v6 = vsel %vm278_vm1, %v841_v2, 0.0  ;;  %v280_v7 = vsel %vm278_vm1, %v843_v3, 0.0  ;;  %v282_v8 = vsel %vm278_vm1, %v845_v4, 0.0  ;;  %v855_v9 = vld [vmem:[%s264_s15 + $0x20] sm:$0xff]  ;;  %v275_v12 = vld [vmem:[%s264_s15 + $0x28] sm:$0xff] }
  0x19   : > { %v281_v10 = vadd.f32 %v280_v7, %v279_v6  ;;  %v284_v11 = vsel %vm278_vm1, %v847_v5, 0.0  ;;  %v286_v14 = vsel %vm278_vm1, %v855_v9, 0.0  ;;  %v276_v15 = vld [vmem:[%s264_s15 + $0x30] sm:$0xff]  ;;  %v288_v17 = vsel %vm278_vm1, %v275_v12, 0.0  ;;  %v277_v18 = vld [vmem:[%s264_s15 + $0x38] sm:$0xff]  ;;  %v476_v50 = vld [vmem:[%s269_s10] sm:$0xff] }
  0x1a   : > { %v290_v20 = vsel %vm278_vm1, %v276_v15, 0.0  ;;  %v292_v22 = vsel %vm278_vm1, %v277_v18, 0.0  ;;  %v466_v47 = vsub.s32 0, %v465_v46  ;;  %v477_v51 = vld [vmem:[%s269_s10 + $0x8] sm:$0xff]  ;;  %v478_v52 = vld [vmem:[%s269_s10 + $0x10] sm:$0xff]  ;;  %v479_v53 = vld [vmem:[%s269_s10 + $0x18] sm:$0xff] }
  0x1b   : > { %v283_v13 = vadd.f32 %v282_v8, %v281_v10  ;;  %v480_v54 = vld [vmem:[%s269_s10 + $0x20] sm:$0xff]  ;;  %v481_v59 = vld [vmem:[%s269_s10 + $0x28] sm:$0xff]  ;;  %v482_v60 = vld [vmem:[%s269_s10 + $0x30] sm:$0xff]  ;;  %s522_s14 = sshll.u32 %s259_s12, 4  ;;  %s905_s25 = scalar_lea.sflag [#allocation3], %s257_s28  ;;  %s893_s14 = int_to_ptr.vmem [resolvable:$true] %s522_s14 }
  0x1c   : > { %v483_v61 = vld [vmem:[%s269_s10 + $0x38] sm:$0xff]  ;;  %s678_s18 = scalar_lea.vmem %s893_s14, 1024  ;;  %p685_p0 = scmp.lt.s32.totalorder %s893_s14, %s683_s20 }
  0x1d   : > { %v285_v16 = vadd.f32 %v284_v11, %v283_v13  ;;  %p679_p11 = scmp.ne.s32.totalorder %s893_s14, %s678_s18  ;;  %p686_p1 = scmp.lt.s32.totalorder %s684_s26, %s678_s18 }
  0x1f   : > { %v287_v19 = vadd.f32 %v286_v14, %v285_v16  ;;  %p680_p12 = pnand %p679_p11, %p818_p5  ;;  %p687_p2 = por %p686_p1, %p685_p0 }
  0x21   : > { %v289_v21 = vadd.f32 %v288_v17, %v287_v19  ;;  %p681_p13 = pneg %p680_p12 }
  0x23   : > { %v291_v23 = vadd.f32 %v290_v20, %v289_v21  ;;  %p688_p3 = pnand %p687_p2, %p681_p13 }
  0x25   : > { %v293_v24 = vadd.f32 %v292_v22, %v291_v23 }
  0x27   : > { %v294_v25 = vrot.slane %v293_v24, 4 }
  0x29   : > { %v295_v26 = vadd.f32 %v294_v25, %v293_v24 }
  0x2b   : > { %v296_v27 = vrot.slane %v295_v26, 2 }
  0x2d   : > { %v297_v28 = vadd.f32 %v296_v27, %v295_v26 }
  0x2f   : > { %v298_v29 = vrot.slane %v297_v28, 1 }
  0x31   : > { %v299_v30 = vadd.f32 %v298_v29, %v297_v28 }
  0x33   : > { %v301_v31 = vmul.f32 0.015625, %v299_v30 }
  0x35   : > { %624 = vmatmul.mubr.msk.f32.vlgmr.msra.gmra.mxu0 %vm278_vm1, %v301_v31 }
  0xf5   : > { %v373_v34 = vpop.f32.mrf.mxu0 }
  0xf6   : > { %v374_v35 = vadd.f32 %v373_v34, %v303_v33 }
  0xf7   : > { %v625_v36 = vpop.f32.mrf.mxu0 }
  0xf8   : > { %v377_v37 = vmax.f32 %v374_v35, 0.0 }
  0xfa   : > { %629 = vmatmul.mubr.msk.f32.vlgmr.msra.gmra.mxu1 %vm380_vm3, %v377_v37 }
 0x1ba   : > { %v454_v39 = vpop.f32.mrf.mxu1 }
 0x1bb   : > { %v455_v40 = vadd.f32 %v454_v39, %v379_v38 }
 0x1bc   : > { %v630_v41 = vpop.f32.mrf.mxu1 }
 0x1bd   : > { %v608_v42 = vmul.f32 -1.442695, %v455_v40 }
 0x1bf   : > { %674 = vpow2.f32 %v608_v42 }
 0x1cc   : > { %v675_v43 = vpop.eup %674 }
 0x1cd   : > { %v461_v44 = vadd.f32 1.0, %v675_v43 }
 0x1cf   : > { %676 = vrcp.f32 %v461_v44 }
 0x1dc   : > { %v677_v48 = vpop.eup %676 }
 0x1dd   : > { %v467_v49 = vrot.slane %v677_v48, %v466_v47 }
 0x1df   : > { %v468_v55 = vmul.f32 %v467_v49, %v841_v2  ;;  %v469_v56 = vmul.f32 %v467_v49, %v843_v3  ;;  %v470_v57 = vmul.f32 %v467_v49, %v845_v4  ;;  %v471_v58 = vmul.f32 %v467_v49, %v847_v5 }
 0x1e0   : > { %v472_v62 = vmul.f32 %v467_v49, %v855_v9  ;;  %v473_v63 = vmul.f32 %v467_v49, %v275_v12  ;;  %v474_v0 = vmul.f32 %v467_v49, %v276_v15  ;;  %v475_v1 = vmul.f32 %v467_v49, %v277_v18 }
 0x1e1   : > { %v484_v6 = vadd.f32 %v476_v50, %v468_v55  ;;  %v485_v7 = vadd.f32 %v477_v51, %v469_v56  ;;  %v486_v2 = vadd.f32 %v478_v52, %v470_v57  ;;  %v487_v8 = vadd.f32 %v479_v53, %v471_v58 }
 0x1e2   : > { %v488_v3 = vadd.f32 %v480_v54, %v472_v62  ;;  %v489_v10 = vadd.f32 %v481_v59, %v473_v63  ;;  %v490_v4 = vadd.f32 %v482_v60, %v474_v0  ;;  %v491_v11 = vadd.f32 %v483_v61, %v475_v1 }
 0x1e3   : > { %v492_v5 = vmax.f32 %v484_v6, 0.0  ;;  %v493_v13 = vmax.f32 %v485_v7, 0.0  ;;  %v494_v14 = vmax.f32 %v486_v2, 0.0  ;;  %v495_v16 = vmax.f32 %v487_v8, 0.0 }
 0x1e4   : > { %v496_v9 = vmax.f32 %v488_v3, 0.0  ;;  %v497_v12 = vmax.f32 %v489_v10, 0.0  ;;  %v498_v15 = vmax.f32 %v490_v4, 0.0  ;;  %v499_v17 = vmax.f32 %v491_v11, 0.0 }
 0x1e5   : > { %500 = vst.msk [vmem:[%s259_s12] sm:$0xff] %vm278_vm1, %v492_v5  ;;  %501 = vst.msk [vmem:[%s259_s12 + $0x8] sm:$0xff] %vm278_vm1, %v493_v13 }
 0x1e6   : > { %502 = vst.msk [vmem:[%s259_s12 + $0x10] sm:$0xff] %vm278_vm1, %v494_v14  ;;  %503 = vst.msk [vmem:[%s259_s12 + $0x18] sm:$0xff] %vm278_vm1, %v495_v16 }
 0x1e7   : > { %504 = vst.msk [vmem:[%s259_s12 + $0x20] sm:$0xff] %vm278_vm1, %v496_v9  ;;  %505 = vst.msk [vmem:[%s259_s12 + $0x28] sm:$0xff] %vm278_vm1, %v497_v12 }
 0x1e8   : > { %506 = vst.msk [vmem:[%s259_s12 + $0x30] sm:$0xff] %vm278_vm1, %v498_v15  ;;  %507 = vst.msk [vmem:[%s259_s12 + $0x38] sm:$0xff] %vm278_vm1, %v499_v17 }
 0x1e9   : > { %691 = shalt.err (!%p688_p3)
}
 0x1ea   : > { %s692_s28 = scalar_lea.hbm %s891_s17, 1024  ;;  %s696_s10 = scalar_lea.hbm %s951_s6, 2048 }
 0x1eb   : > { %p693_p4 = scmp.ne.s32.totalorder %s891_s17, %s692_s28  ;;  %p697_p9 = scmp.lt.s32.totalorder %s891_s17, %s951_s6 }
 0x1ec   : > { %p698_p10 = scmp.lt.s32.totalorder %s696_s10, %s692_s28 }
 0x1ed   : > { %p694_p7 = pnand %p693_p4, %p818_p5 }
 0x1ee   : > { %p699_p11 = por %p698_p10, %p697_p9 }
 0x1ef   : > { %p695_p8 = pneg %p694_p7 }
 0x1f1   : > { %p700_p12 = pnand %p699_p11, %p695_p8 }
 0x1f3   : > { %703 = shalt.err (!%p700_p12)
}
 0x1f4   : > { %s743_s12 = smov 128   ;;  %s744_s15 = smov 8  }
 0x1f5   : > { %631 = dma.vmem_to_hbm [thread:$0]  (%p818_p5), %s893_s14, 1024, %s891_s17, %s905_s25, %s743_s12, %s743_s12, %s744_s15  }
 0x1f6 PF: > { %p637_p13 = scmp.ge.s32.totalorder %s738_s24, 2  ;;  %s537_s16 = sand.u32 1, %s726_s21  }
 0x1f7   : > { %s538_s18 = scalar_lea.sflag [#allocation3], %s537_s16 }
 0x1f8   : > { %p634_p0 = pnand %p637_p13, %p822_p6 }
 0x1fa   : > { %p635_p1 = pneg %p634_p0 }
 0x1fc   : > { %721 = dma.done.wait (%p635_p1), %s538_s18, 1024  }
 0x1fd   : > { %723 = vsyncadd (%p635_p1), %s538_s18, 4294966272  ;;  %p16_p2 = scmp.ge.s32.totalorder %s805_s27, 4   ;;  %s954_s21 = smov %s730_s22 }
 0x1fe   : > { %s955_s22 = smov %s734_s23  ;;  %s956_s23 = smov %s816_s30 }
 0x1ff   : > { %s957_s24 = smov %s805_s27  ;;  %18 = sbr.rel (!%p16_p2) target bundleno = 3 (0x3), region = 82 }
 0x204   :  { %543 = vsyncpa [#allocation3], 1 }
 0x205   :  { %545 = vsyncpa [#allocation3 + $0x1], 1 }

</bundles_post_ra>
